<compile_context>
chip_gen: v7x
topology: tpu7x:2x2x1
jax: 0.10.0
libtpu: 0.0.40
codegen_flags: <defaults>
</compile_context>

<pallas_src>
import functools

import jax
import jax.numpy as jnp
from jax import lax
from jax.experimental import pallas as pl
from jax.experimental.pallas import tpu as pltpu


def _round_up(n, m):
    return ((n + m - 1) // m) * m


# ----------------------------------------------------------------------------
# Kernel
# ----------------------------------------------------------------------------
def _decoder_layer_kernel(x_ref, wA_ref, wB_ref, cc_ref, bias_ref, gamma_ref,
                          o_ref, *, bblk, C, W):
    f32, bf16 = jnp.float32, jnp.bfloat16
    C2, C4, C16 = C // 2, C // 4, C // 16
    C16p = _round_up(C16, 8)          # theta/phi row blocks zero-padded to 8 rows
    W2, W4 = W // 2, W // 4

    def mm(a, b):
        return jnp.dot(a, b, preferred_element_type=f32)

    xf = x_ref[...]                                       # (C, bblk*W) f32 slab
    w1, wtpg = wA_ref[:C2], wA_ref[C2:]
    w2, w3 = wB_ref[:C2], wB_ref[C2:C]
    w4, wo2 = wB_ref[C:2 * C], wB_ref[2 * C:]
    bias = bias_ref[...]
    cc = cc_ref[...]
    gamma = gamma_ref[0, 0]

    # ---- mutate: 4 x (ConvTranspose1d(kernel_size=1) + ReLU), then residual ----
    # TODO(synk): ConvolutionalTransposeBlock definition was not provided; assumed
    # ConvTranspose1d(kernel_size=1, bias=True) + ReLU (no norm layer).
    # Activations stay bf16 between layers; the residual add is f32.
    h = jnp.maximum(mm(w1, xf.astype(bf16)).astype(bf16) + bias[:C2, 0:1].astype(bf16), 0)
    h = jnp.maximum(mm(w2, h).astype(bf16) + bias[:C2, 1:2].astype(bf16), 0)
    h = jnp.maximum(mm(w3, h).astype(bf16) + bias[:C2, 2:3].astype(bf16), 0)
    h = jnp.maximum(mm(w4, h) + bias[:, 3:4], 0.0)        # (C, bblk*W) f32
    src = h + xf                                          # (C, bblk*W) f32

    # ---- fused projections: rows = [theta_even; theta_odd; (phi,g)_even; (phi,g)_odd]
    tpg = mm(wtpg, src.astype(bf16)).astype(bf16)         # (4*C16p + C/2, bblk*W)
    th2 = tpg[:2 * C16p]                                  # theta: even rows then odd rows
    o_e, o_o = 2 * C16p, 3 * C16p + C4
    # MaxPool2d(2,2) channel-pair max (even/odd row projections precomputed on host).
    pg_cp = jnp.maximum(tpg[o_e:o_o], tpg[o_o:])          # (C16p + C/4, bblk*W) bf16

    # ---- per-batch pooled attention (unrolled over the folded batch block) ------
    for b in range(bblk):
        lo, hi = b * W, (b + 1) * W                       # 128-lane aligned slices
        # width-pair max: one 0/1 selection matmul picks (even | odd) lanes, then max
        q = mm(pg_cp[:, lo:hi], cc)                       # (C16p + C/4, W) f32
        p = jnp.maximum(q[:, :W2], q[:, W2:])             # pooled, (C16p + C/4, W/2)
        # row-major ".view": left/right pooled halves become even/odd channel rows;
        # folded into the even/odd ordering of th2 / wo2 (precomputed on host).
        pp2 = jnp.concatenate([p[:C16p, :W4], p[:C16p, W4:]], axis=0).astype(bf16)
        pg2 = jnp.concatenate([p[C16p:, :W4], p[C16p:, W4:]], axis=0).astype(bf16)
        # attention logits, already transposed: lane-dense (W/4, W) softmax layout.
        s = lax.dot_general(pp2, th2[:, lo:hi], (((0,), (0,)), ((), ())),
                            preferred_element_type=f32)
        s = s - jnp.max(s, axis=0, keepdims=True)
        e = jnp.exp(s)
        attn_t = e * pl.reciprocal(jnp.sum(e, axis=0, keepdims=True), approx=True)
        m = mm(wo2, pg2)                                  # == snconv1x1_o(g_view): (C, W/4)
        attn_o = mm(m.astype(bf16), attn_t.astype(bf16))  # (C, W) f32
        # src2 = src + gamma*attn_o ; out = src + dropout(src2) == 2*src + gamma*attn_o
        # TODO(synk): training-mode dropout (p=0.1 mask + 1/(1-p) scaling) not implemented.
        o_ref[:, lo:hi] = (2.0 * src[:, lo:hi] + gamma * attn_o).astype(o_ref.dtype)


# ----------------------------------------------------------------------------
# Host-side constant packing (weights reordered/fused once per call)
# ----------------------------------------------------------------------------
def _pack_params(params, C, W):
    w1, b1, w2, b2, w3, b3, w4, b4, wt, wp, wg, wo, gamma = params
    C2, C4, C16 = C // 2, C // 4, C // 16
    C16p = _round_up(C16, 8)
    W2 = W // 2
    bf16 = jnp.bfloat16

    def pad_rows(m, rows):
        if m.shape[0] == rows:
            return m
        return jnp.concatenate(
            [m, jnp.zeros((rows - m.shape[0], m.shape[1]), m.dtype)], axis=0)

    wt_e, wt_o = pad_rows(wt[0::2], C16p), pad_rows(wt[1::2], C16p)
    wp_e, wp_o = pad_rows(wp[0::2], C16p), pad_rows(wp[1::2], C16p)
    wg_e, wg_o = wg[0::2], wg[1::2]
    # fused projection weight: [theta_even; theta_odd; phi_even; g_even; phi_odd; g_odd]
    wtpg = jnp.concatenate([wt_e, wt_o, wp_e, wg_e, wp_o, wg_o], axis=0)
    wA = jnp.concatenate([w1, wtpg], axis=0).astype(bf16)             # (C/2 + 4*C16p + C/2, C)

    wo2 = jnp.concatenate([wo[:, 0::2], wo[:, 1::2]], axis=1)         # even/odd output columns
    wB = jnp.concatenate([w2, w3, w4, wo2], axis=0).astype(bf16)      # (3C, C/2)

    # width-pool selector: column c < W/2 picks lane 2c, column c >= W/2 picks lane
    # 2(c - W/2) + 1; exact 0/1 values, so bf16 storage is lossless.
    r = jnp.arange(W, dtype=jnp.int32)[:, None]
    c = jnp.arange(W, dtype=jnp.int32)[None, :]
    cc = jnp.where(c < W2, r == 2 * c, r == 2 * (c - W2) + 1).astype(bf16)

    bias = jnp.zeros((C, 4), jnp.float32)
    bias = bias.at[:C2, 0].set(b1[:, 0]).at[:C2, 1].set(b2[:, 0])
    bias = bias.at[:C2, 2].set(b3[:, 0]).at[:, 3].set(b4[:, 0])

    gamma2 = jnp.reshape(gamma, (1, 1)).astype(jnp.float32)
    return wA, wB, cc, bias, gamma2


# ----------------------------------------------------------------------------
# Wrapper
# ----------------------------------------------------------------------------
def transformer_decoder_layer(x, params, *, bblk=None):
    B, C, W = x.shape
    assert C % 16 == 0 and W % 4 == 0, "channels % 16 == 0 and width % 4 == 0 required"

    if bblk is None:
        # Fold several batch elements into the lane axis (wide MXU N, fewer grid
        # steps), capped at bblk*W <= 1024; keep >= 2 grid steps when possible so
        # both v7x TensorCores get work.
        candidates = [d for d in range(1, B + 1) if B % d == 0 and d * W <= 1024] or [1]
        two_step = [d for d in candidates if B // d >= 2]
        bblk = max(two_step) if two_step else max(candidates)
    assert B % bblk == 0
    G, BW = B // bblk, bblk * W

    wA, wB, cc, bias, gamma2 = _pack_params(params, C, W)

    # Batch -> lane fold in the wrapper (layout plumbing only): each grid step sees
    # one lane-dense (C, bblk*W) slab.
    xf = x.reshape(G, bblk, C, W).transpose(0, 2, 1, 3).reshape(G * C, BW)

    def const_spec(a):
        n = a.ndim
        return pl.BlockSpec(a.shape, lambda i, n=n: (0,) * n)

    kernel = functools.partial(_decoder_layer_kernel, bblk=bblk, C=C, W=W)

    out = pl.pallas_call(
        kernel,
        out_shape=jax.ShapeDtypeStruct((G * C, BW), x.dtype),
        grid=(G,),
        in_specs=[pl.BlockSpec((C, BW), lambda i: (i, 0)),
                  const_spec(wA), const_spec(wB), const_spec(cc), const_spec(bias),
                  pl.BlockSpec(memory_space=pltpu.MemorySpace.SMEM)],
        out_specs=pl.BlockSpec((C, BW), lambda i: (i, 0)),
        compiler_params=pltpu.CompilerParams(dimension_semantics=("parallel",)),
    )(xf, wA, wB, cc, bias, gamma2)

    return out.reshape(G, C, bblk, W).transpose(0, 2, 1, 3).reshape(B, C, W)


# ----------------------------------------------------------------------------
# Deterministic parameter construction (synthetic weights, no checkpoint load)
# ----------------------------------------------------------------------------
def _spectral_normalize(w, eps=1e-12, n_iter=50):
    """Divide a (out, in) weight by its top singular value (power iteration)."""
    def body(_, uv):
        u, _v = uv
        v = w.T @ u
        v = v / (jnp.linalg.norm(v) + eps)
        u = w @ v
        u = u / (jnp.linalg.norm(u) + eps)
        return (u, v)

    u0 = jnp.ones((w.shape[0],), w.dtype) / jnp.sqrt(jnp.float32(w.shape[0]))
    v0 = jnp.ones((w.shape[1],), w.dtype) / jnp.sqrt(jnp.float32(w.shape[1]))
    u, v = lax.fori_loop(0, n_iter, body, (u0, v0))
    sigma = u @ (w @ v)
    return w / (sigma + eps)


def init_params(key, channels):
    C = channels
    oc = C // 2
    ks = jax.random.split(key, 12)

    def unif(k, shape, fan_in):
        bound = 1.0 / jnp.sqrt(jnp.float32(fan_in))
        return jax.random.uniform(k, shape, jnp.float32, -bound, bound)

    # mutate: channels -> C/2 -> C/2 -> C/2 -> channels (all kernel_size=1)
    w1, b1 = unif(ks[0], (oc, C), C), unif(ks[1], (oc, 1), C)
    w2, b2 = unif(ks[2], (oc, oc), oc), unif(ks[3], (oc, 1), oc)
    w3, b3 = unif(ks[4], (oc, oc), oc), unif(ks[5], (oc, 1), oc)
    w4, b4 = unif(ks[6], (C, oc), oc), unif(ks[7], (C, 1), oc)

    # NonLocalSelfAttention spectral-norm 1x1 conv weights (bias=False)
    wt = _spectral_normalize(unif(ks[8], (C // 8, C), C))
    wp = _spectral_normalize(unif(ks[9], (C // 8, C), C))
    wg = _spectral_normalize(unif(ks[10], (C // 2, C), C))
    wo = _spectral_normalize(unif(ks[11], (C, C // 2), C // 2))

    gamma = jnp.zeros((1, 1), jnp.float32)   # nn.Parameter(torch.zeros(1))

    return [w1, b1, w2, b2, w3, b3, w4, b4, wt, wp, wg, wo, gamma]


# ----------------------------------------------------------------------------
# Pure-JAX f32 reference (same math, standard jnp ops) for a sanity check
# ----------------------------------------------------------------------------
def reference_forward(x, params):
    w1, b1, w2, b2, w3, b3, w4, b4, wt, wp, wg, wo, gamma = params

    def pool_view(t):
        ct, w = t.shape
        p = t.reshape(ct // 2, 2, w // 2, 2).max(axis=(1, 3))
        return p.reshape(ct, w // 4)

    def per_batch(xb):
        h = jnp.maximum(w1 @ xb + b1, 0.0)
        h = jnp.maximum(w2 @ h + b2, 0.0)
        h = jnp.maximum(w3 @ h + b3, 0.0)
        h = jnp.maximum(w4 @ h + b4, 0.0)
        src = h + xb
        theta, phi, g = wt @ src, wp @ src, wg @ src
        phi_v, g_v = pool_view(phi), pool_view(g)
        attn = jax.nn.softmax(theta.T @ phi_v, axis=-1)
        attn_g = g_v @ attn.T
        src2 = src + gamma[0, 0] * (wo @ attn_g)
        return src + src2

    return jax.vmap(per_batch)(x)


# ----------------------------------------------------------------------------
if __name__ == "__main__":
    B, C, W = 8, 64, 128          # (batch, channels, width); bblk=4 -> grid of 2
    key = jax.random.PRNGKey(0)
    kx, kp = jax.random.split(key)

    x = jax.random.normal(kx, (B, C, W), jnp.float32)
    params = init_params(kp, C)

    out = jax.block_until_ready(transformer_decoder_layer(x, params))
    assert out.shape == (B, C, W) and out.dtype == jnp.float32

    ref = reference_forward(x, params)
    rel_err = jnp.max(jnp.abs(out - ref)) / (jnp.max(jnp.abs(ref)) + 1e-6)
    assert bool(rel_err < 5e-2), f"mismatch vs reference: rel_err={rel_err}"

    # Extra consistency check with nonzero gamma so the attention branch
    # actually contributes numerically (gamma is 0 at PyTorch init).
    params_g = list(params)
    params_g[-1] = jnp.full((1, 1), 0.5, jnp.float32)
    out_g = jax.block_until_ready(transformer_decoder_layer(x, params_g))
    ref_g = reference_forward(x, params_g)
    rel_err_g = jnp.max(jnp.abs(out_g - ref_g)) / (jnp.max(jnp.abs(ref_g)) + 1e-6)
    assert bool(rel_err_g < 5e-2), f"mismatch vs reference (gamma!=0): rel_err={rel_err_g}"

    print("KERNEL_OK")
</pallas_src>

<mosaic_0001>
module attributes {stable_mosaic.version = 11 : i64} {
  func.func @_decoder_layer_kernel(%arg0: i32, %arg1: memref<64x512xf32, #tpu.memory_space<vmem>>, %arg2: memref<96x64xbf16, #tpu.memory_space<vmem>>, %arg3: memref<192x32xbf16, #tpu.memory_space<vmem>>, %arg4: memref<128x128xbf16, #tpu.memory_space<vmem>>, %arg5: memref<64x4xf32, #tpu.memory_space<vmem>>, %arg6: memref<1x1xf32, #tpu.memory_space<smem>>, %arg7: memref<64x512xf32, #tpu.memory_space<vmem>>) attributes {dimension_semantics = [#tpu.dimension_semantics<parallel>], iteration_bounds = array<i64: 2>, scalar_prefetch = 0 : i64, scratch_operands = 0 : i64, tpu.core_type = #tpu.core_type<tc>, window_params = [{transform_indices = @transform_0, window_bounds = array<i64: 64, 512>}, {pipeline_mode = #tpu.pipeline_mode<synchronous>, transform_indices = @transform_1, window_bounds = array<i64: 96, 64>}, {pipeline_mode = #tpu.pipeline_mode<synchronous>, transform_indices = @transform_2, window_bounds = array<i64: 192, 32>}, {pipeline_mode = #tpu.pipeline_mode<synchronous>, transform_indices = @transform_3, window_bounds = array<i64: 128, 128>}, {pipeline_mode = #tpu.pipeline_mode<synchronous>, transform_indices = @transform_4, window_bounds = array<i64: 64, 4>}, {transform_indices = @transform_5, window_bounds = array<i64: 1, 1>}, {transform_indices = @transform_6, window_bounds = array<i64: 64, 512>}]} {
    %c0 = arith.constant 0 : index
    %c0_0 = arith.constant 0 : index
    %0 = vector.load %arg1[%c0, %c0_0] : memref<64x512xf32, #tpu.memory_space<vmem>>, vector<64x512xf32>
    %c0_1 = arith.constant 0 : index
    %c0_2 = arith.constant 0 : index
    %1 = vector.load %arg2[%c0_1, %c0_2] : memref<96x64xbf16, #tpu.memory_space<vmem>>, vector<32x64xbf16>
    %c32 = arith.constant 32 : index
    %c0_3 = arith.constant 0 : index
    %2 = vector.load %arg2[%c32, %c0_3] : memref<96x64xbf16, #tpu.memory_space<vmem>>, vector<64x64xbf16>
    %c0_4 = arith.constant 0 : index
    %c0_5 = arith.constant 0 : index
    %3 = vector.load %arg3[%c0_4, %c0_5] : memref<192x32xbf16, #tpu.memory_space<vmem>>, vector<32x32xbf16>
    %c32_6 = arith.constant 32 : index
    %c0_7 = arith.constant 0 : index
    %4 = vector.load %arg3[%c32_6, %c0_7] : memref<192x32xbf16, #tpu.memory_space<vmem>>, vector<32x32xbf16>
    %c64 = arith.constant 64 : index
    %c0_8 = arith.constant 0 : index
    %5 = vector.load %arg3[%c64, %c0_8] : memref<192x32xbf16, #tpu.memory_space<vmem>>, vector<64x32xbf16>
    %c128 = arith.constant 128 : index
    %c0_9 = arith.constant 0 : index
    %6 = vector.load %arg3[%c128, %c0_9] : memref<192x32xbf16, #tpu.memory_space<vmem>>, vector<64x32xbf16>
    %c0_10 = arith.constant 0 : index
    %c0_11 = arith.constant 0 : index
    %7 = vector.load %arg5[%c0_10, %c0_11] : memref<64x4xf32, #tpu.memory_space<vmem>>, vector<64x4xf32>
    %c0_12 = arith.constant 0 : index
    %c0_13 = arith.constant 0 : index
    %8 = vector.load %arg4[%c0_12, %c0_13] : memref<128x128xbf16, #tpu.memory_space<vmem>>, vector<128x128xbf16>
    %c0_14 = arith.constant 0 : index
    %c0_15 = arith.constant 0 : index
    %9 = memref.load %arg6[%c0_14, %c0_15] : memref<1x1xf32, #tpu.memory_space<smem>>
    %10 = arith.truncf %0 : vector<64x512xf32> to vector<64x512xbf16>
    %cst = arith.constant dense<0.000000e+00> : vector<32x512xf32>
    %11 = tpu.matmul %1, %10, %cst {dimension_numbers = #tpu.dot_dimension_numbers<[1], [0], [0], [1], [0, 0, 1, 1], [], []>} : vector<32x64xbf16>, vector<64x512xbf16>, vector<32x512xf32> -> vector<32x512xf32>
    %12 = arith.truncf %11 : vector<32x512xf32> to vector<32x512xbf16>
    %13 = vector.extract_strided_slice %7 {offsets = [0, 0], sizes = [32, 1], strides = [1, 1]} : vector<64x4xf32> to vector<32x1xf32>
    %14 = arith.truncf %13 : vector<32x1xf32> to vector<32x1xbf16>
    %15 = vector.broadcast %14 : vector<32x1xbf16> to vector<32x512xbf16>
    %16 = arith.addf %12, %15 : vector<32x512xbf16>
    %cst_16 = arith.constant 0.000000e+00 : bf16
    %17 = vector.broadcast %cst_16 : bf16 to vector<32x512xbf16>
    %18 = arith.maximumf %16, %17 : vector<32x512xbf16>
    %cst_17 = arith.constant dense<0.000000e+00> : vector<32x512xf32>
    %19 = tpu.matmul %3, %18, %cst_17 {dimension_numbers = #tpu.dot_dimension_numbers<[1], [0], [0], [1], [0, 0, 1, 1], [], []>} : vector<32x32xbf16>, vector<32x512xbf16>, vector<32x512xf32> -> vector<32x512xf32>
    %20 = arith.truncf %19 : vector<32x512xf32> to vector<32x512xbf16>
    %21 = vector.extract_strided_slice %7 {offsets = [0, 1], sizes = [32, 1], strides = [1, 1]} : vector<64x4xf32> to vector<32x1xf32>
    %22 = arith.truncf %21 : vector<32x1xf32> to vector<32x1xbf16>
    %23 = vector.broadcast %22 : vector<32x1xbf16> to vector<32x512xbf16>
    %24 = arith.addf %20, %23 : vector<32x512xbf16>
    %cst_18 = arith.constant 0.000000e+00 : bf16
    %25 = vector.broadcast %cst_18 : bf16 to vector<32x512xbf16>
    %26 = arith.maximumf %24, %25 : vector<32x512xbf16>
    %cst_19 = arith.constant dense<0.000000e+00> : vector<32x512xf32>
    %27 = tpu.matmul %4, %26, %cst_19 {dimension_numbers = #tpu.dot_dimension_numbers<[1], [0], [0], [1], [0, 0, 1, 1], [], []>} : vector<32x32xbf16>, vector<32x512xbf16>, vector<32x512xf32> -> vector<32x512xf32>
    %28 = arith.truncf %27 : vector<32x512xf32> to vector<32x512xbf16>
    %29 = vector.extract_strided_slice %7 {offsets = [0, 2], sizes = [32, 1], strides = [1, 1]} : vector<64x4xf32> to vector<32x1xf32>
    %30 = arith.truncf %29 : vector<32x1xf32> to vector<32x1xbf16>
    %31 = vector.broadcast %30 : vector<32x1xbf16> to vector<32x512xbf16>
    %32 = arith.addf %28, %31 : vector<32x512xbf16>
    %cst_20 = arith.constant 0.000000e+00 : bf16
    %33 = vector.broadcast %cst_20 : bf16 to vector<32x512xbf16>
    %34 = arith.maximumf %32, %33 : vector<32x512xbf16>
    %cst_21 = arith.constant dense<0.000000e+00> : vector<64x512xf32>
    %35 = tpu.matmul %5, %34, %cst_21 {dimension_numbers = #tpu.dot_dimension_numbers<[1], [0], [0], [1], [0, 0, 1, 1], [], []>} : vector<64x32xbf16>, vector<32x512xbf16>, vector<64x512xf32> -> vector<64x512xf32>
    %36 = vector.extract_strided_slice %7 {offsets = [0, 3], sizes = [64, 1], strides = [1, 1]} : vector<64x4xf32> to vector<64x1xf32>
    %37 = vector.broadcast %36 : vector<64x1xf32> to vector<64x512xf32>
    %38 = arith.addf %35, %37 : vector<64x512xf32>
    %cst_22 = arith.constant 0.000000e+00 : f32
    %39 = vector.broadcast %cst_22 : f32 to vector<64x512xf32>
    %40 = arith.maximumf %38, %39 : vector<64x512xf32>
    %41 = arith.addf %40, %0 : vector<64x512xf32>
    %42 = arith.truncf %41 : vector<64x512xf32> to vector<64x512xbf16>
    %cst_23 = arith.constant dense<0.000000e+00> : vector<64x512xf32>
    %43 = tpu.matmul %2, %42, %cst_23 {dimension_numbers = #tpu.dot_dimension_numbers<[1], [0], [0], [1], [0, 0, 1, 1], [], []>} : vector<64x64xbf16>, vector<64x512xbf16>, vector<64x512xf32> -> vector<64x512xf32>
    %44 = arith.truncf %43 : vector<64x512xf32> to vector<64x512xbf16>
    %45 = vector.extract_strided_slice %44 {offsets = [0, 0], sizes = [16, 512], strides = [1, 1]} : vector<64x512xbf16> to vector<16x512xbf16>
    %46 = vector.extract_strided_slice %44 {offsets = [16, 0], sizes = [24, 512], strides = [1, 1]} : vector<64x512xbf16> to vector<24x512xbf16>
    %47 = vector.extract_strided_slice %44 {offsets = [40, 0], sizes = [24, 512], strides = [1, 1]} : vector<64x512xbf16> to vector<24x512xbf16>
    %48 = arith.maximumf %46, %47 : vector<24x512xbf16>
    %49 = vector.extract_strided_slice %48 {offsets = [0, 0], sizes = [24, 128], strides = [1, 1]} : vector<24x512xbf16> to vector<24x128xbf16>
    %cst_24 = arith.constant dense<0.000000e+00> : vector<24x128xf32>
    %50 = tpu.matmul %49, %8, %cst_24 {dimension_numbers = #tpu.dot_dimension_numbers<[1], [0], [0], [1], [0, 0, 1, 1], [], []>} : vector<24x128xbf16>, vector<128x128xbf16>, vector<24x128xf32> -> vector<24x128xf32>
    %51 = vector.extract_strided_slice %50 {offsets = [0, 0], sizes = [24, 64], strides = [1, 1]} : vector<24x128xf32> to vector<24x64xf32>
    %52 = vector.extract_strided_slice %50 {offsets = [0, 64], sizes = [24, 64], strides = [1, 1]} : vector<24x128xf32> to vector<24x64xf32>
    %53 = arith.maximumf %51, %52 : vector<24x64xf32>
    %54 = vector.extract_strided_slice %53 {offsets = [0, 0], sizes = [8, 32], strides = [1, 1]} : vector<24x64xf32> to vector<8x32xf32>
    %55 = vector.extract_strided_slice %53 {offsets = [0, 32], sizes = [8, 32], strides = [1, 1]} : vector<24x64xf32> to vector<8x32xf32>
    %56 = tpu.concatenate %54, %55 in 0 : vector<8x32xf32>, vector<8x32xf32> -> vector<16x32xf32>
    %57 = arith.truncf %56 : vector<16x32xf32> to vector<16x32xbf16>
    %58 = vector.extract_strided_slice %53 {offsets = [8, 0], sizes = [16, 32], strides = [1, 1]} : vector<24x64xf32> to vector<16x32xf32>
    %59 = vector.extract_strided_slice %53 {offsets = [8, 32], sizes = [16, 32], strides = [1, 1]} : vector<24x64xf32> to vector<16x32xf32>
    %60 = tpu.concatenate %58, %59 in 0 : vector<16x32xf32>, vector<16x32xf32> -> vector<32x32xf32>
    %61 = arith.truncf %60 : vector<32x32xf32> to vector<32x32xbf16>
    %62 = vector.extract_strided_slice %45 {offsets = [0, 0], sizes = [16, 128], strides = [1, 1]} : vector<16x512xbf16> to vector<16x128xbf16>
    %cst_25 = arith.constant dense<0.000000e+00> : vector<32x128xf32>
    %63 = tpu.matmul %57, %62, %cst_25 {dimension_numbers = #tpu.dot_dimension_numbers<[0], [0], [1], [1], [0, 1, 1, 1], [], []>} : vector<16x32xbf16>, vector<16x128xbf16>, vector<32x128xf32> -> vector<32x128xf32>
    %cst_26 = arith.constant dense<0xFF800000> : vector<128xf32>
    %64 = vector.multi_reduction <maximumf>, %63, %cst_26 [0] : vector<32x128xf32> to vector<128xf32>
    %65 = vector.shape_cast %64 : vector<128xf32> to vector<1x128xf32>
    %66 = vector.broadcast %65 : vector<1x128xf32> to vector<32x128xf32>
    %67 = arith.subf %63, %66 : vector<32x128xf32>
    %68 = math.exp %67 : vector<32x128xf32>
    %cst_27 = arith.constant dense<0.000000e+00> : vector<128xf32>
    %69 = vector.multi_reduction <add>, %68, %cst_27 [0] : vector<32x128xf32> to vector<128xf32>
    %70 = vector.shape_cast %69 : vector<128xf32> to vector<1x128xf32>
    %71 = tpu.reciprocal %70 {approx = true} : vector<1x128xf32> -> vector<1x128xf32>
    %72 = vector.broadcast %71 : vector<1x128xf32> to vector<32x128xf32>
    %73 = arith.mulf %68, %72 : vector<32x128xf32>
    %cst_28 = arith.constant dense<0.000000e+00> : vector<64x32xf32>
    %74 = tpu.matmul %6, %61, %cst_28 {dimension_numbers = #tpu.dot_dimension_numbers<[1], [0], [0], [1], [0, 0, 1, 1], [], []>} : vector<64x32xbf16>, vector<32x32xbf16>, vector<64x32xf32> -> vector<64x32xf32>
    %75 = arith.truncf %74 : vector<64x32xf32> to vector<64x32xbf16>
    %76 = arith.truncf %73 : vector<32x128xf32> to vector<32x128xbf16>
    %cst_29 = arith.constant dense<0.000000e+00> : vector<64x128xf32>
    %77 = tpu.matmul %75, %76, %cst_29 {dimension_numbers = #tpu.dot_dimension_numbers<[1], [0], [0], [1], [0, 0, 1, 1], [], []>} : vector<64x32xbf16>, vector<32x128xbf16>, vector<64x128xf32> -> vector<64x128xf32>
    %78 = vector.extract_strided_slice %41 {offsets = [0, 0], sizes = [64, 128], strides = [1, 1]} : vector<64x512xf32> to vector<64x128xf32>
    %cst_30 = arith.constant 2.000000e+00 : f32
    %79 = vector.broadcast %cst_30 : f32 to vector<64x128xf32>
    %80 = arith.mulf %79, %78 : vector<64x128xf32>
    %81 = vector.broadcast %9 : f32 to vector<64x128xf32>
    %82 = arith.mulf %81, %77 : vector<64x128xf32>
    %83 = arith.addf %80, %82 : vector<64x128xf32>
    %c0_31 = arith.constant 0 : index
    %c0_32 = arith.constant 0 : index
    %84 = vector.load %arg7[%c0_31, %c0_32] : memref<64x512xf32, #tpu.memory_space<vmem>>, vector<64x128xf32>
    tpu.vector_store %arg7[%c0_31, %c0_32], %83 {strides = array<i32>} : memref<64x512xf32, #tpu.memory_space<vmem>>, vector<64x128xf32>,
    %85 = vector.extract_strided_slice %48 {offsets = [0, 128], sizes = [24, 128], strides = [1, 1]} : vector<24x512xbf16> to vector<24x128xbf16>
    %cst_33 = arith.constant dense<0.000000e+00> : vector<24x128xf32>
    %86 = tpu.matmul %85, %8, %cst_33 {dimension_numbers = #tpu.dot_dimension_numbers<[1], [0], [0], [1], [0, 0, 1, 1], [], []>} : vector<24x128xbf16>, vector<128x128xbf16>, vector<24x128xf32> -> vector<24x128xf32>
    %87 = vector.extract_strided_slice %86 {offsets = [0, 0], sizes = [24, 64], strides = [1, 1]} : vector<24x128xf32> to vector<24x64xf32>
    %88 = vector.extract_strided_slice %86 {offsets = [0, 64], sizes = [24, 64], strides = [1, 1]} : vector<24x128xf32> to vector<24x64xf32>
    %89 = arith.maximumf %87, %88 : vector<24x64xf32>
    %90 = vector.extract_strided_slice %89 {offsets = [0, 0], sizes = [8, 32], strides = [1, 1]} : vector<24x64xf32> to vector<8x32xf32>
    %91 = vector.extract_strided_slice %89 {offsets = [0, 32], sizes = [8, 32], strides = [1, 1]} : vector<24x64xf32> to vector<8x32xf32>
    %92 = tpu.concatenate %90, %91 in 0 : vector<8x32xf32>, vector<8x32xf32> -> vector<16x32xf32>
    %93 = arith.truncf %92 : vector<16x32xf32> to vector<16x32xbf16>
    %94 = vector.extract_strided_slice %89 {offsets = [8, 0], sizes = [16, 32], strides = [1, 1]} : vector<24x64xf32> to vector<16x32xf32>
    %95 = vector.extract_strided_slice %89 {offsets = [8, 32], sizes = [16, 32], strides = [1, 1]} : vector<24x64xf32> to vector<16x32xf32>
    %96 = tpu.concatenate %94, %95 in 0 : vector<16x32xf32>, vector<16x32xf32> -> vector<32x32xf32>
    %97 = arith.truncf %96 : vector<32x32xf32> to vector<32x32xbf16>
    %98 = vector.extract_strided_slice %45 {offsets = [0, 128], sizes = [16, 128], strides = [1, 1]} : vector<16x512xbf16> to vector<16x128xbf16>
    %cst_34 = arith.constant dense<0.000000e+00> : vector<32x128xf32>
    %99 = tpu.matmul %93, %98, %cst_34 {dimension_numbers = #tpu.dot_dimension_numbers<[0], [0], [1], [1], [0, 1, 1, 1], [], []>} : vector<16x32xbf16>, vector<16x128xbf16>, vector<32x128xf32> -> vector<32x128xf32>
    %cst_35 = arith.constant dense<0xFF800000> : vector<128xf32>
    %100 = vector.multi_reduction <maximumf>, %99, %cst_35 [0] : vector<32x128xf32> to vector<128xf32>
    %101 = vector.shape_cast %100 : vector<128xf32> to vector<1x128xf32>
    %102 = vector.broadcast %101 : vector<1x128xf32> to vector<32x128xf32>
    %103 = arith.subf %99, %102 : vector<32x128xf32>
    %104 = math.exp %103 : vector<32x128xf32>
    %cst_36 = arith.constant dense<0.000000e+00> : vector<128xf32>
    %105 = vector.multi_reduction <add>, %104, %cst_36 [0] : vector<32x128xf32> to vector<128xf32>
    %106 = vector.shape_cast %105 : vector<128xf32> to vector<1x128xf32>
    %107 = tpu.reciprocal %106 {approx = true} : vector<1x128xf32> -> vector<1x128xf32>
    %108 = vector.broadcast %107 : vector<1x128xf32> to vector<32x128xf32>
    %109 = arith.mulf %104, %108 : vector<32x128xf32>
    %cst_37 = arith.constant dense<0.000000e+00> : vector<64x32xf32>
    %110 = tpu.matmul %6, %97, %cst_37 {dimension_numbers = #tpu.dot_dimension_numbers<[1], [0], [0], [1], [0, 0, 1, 1], [], []>} : vector<64x32xbf16>, vector<32x32xbf16>, vector<64x32xf32> -> vector<64x32xf32>
    %111 = arith.truncf %110 : vector<64x32xf32> to vector<64x32xbf16>
    %112 = arith.truncf %109 : vector<32x128xf32> to vector<32x128xbf16>
    %cst_38 = arith.constant dense<0.000000e+00> : vector<64x128xf32>
    %113 = tpu.matmul %111, %112, %cst_38 {dimension_numbers = #tpu.dot_dimension_numbers<[1], [0], [0], [1], [0, 0, 1, 1], [], []>} : vector<64x32xbf16>, vector<32x128xbf16>, vector<64x128xf32> -> vector<64x128xf32>
    %114 = vector.extract_strided_slice %41 {offsets = [0, 128], sizes = [64, 128], strides = [1, 1]} : vector<64x512xf32> to vector<64x128xf32>
    %cst_39 = arith.constant 2.000000e+00 : f32
    %115 = vector.broadcast %cst_39 : f32 to vector<64x128xf32>
    %116 = arith.mulf %115, %114 : vector<64x128xf32>
    %117 = vector.broadcast %9 : f32 to vector<64x128xf32>
    %118 = arith.mulf %117, %113 : vector<64x128xf32>
    %119 = arith.addf %116, %118 : vector<64x128xf32>
    %c0_40 = arith.constant 0 : index
    %c128_41 = arith.constant 128 : index
    %120 = vector.load %arg7[%c0_40, %c128_41] : memref<64x512xf32, #tpu.memory_space<vmem>>, vector<64x128xf32>
    tpu.vector_store %arg7[%c0_40, %c128_41], %119 {strides = array<i32>} : memref<64x512xf32, #tpu.memory_space<vmem>>, vector<64x128xf32>,
    %121 = vector.extract_strided_slice %48 {offsets = [0, 256], sizes = [24, 128], strides = [1, 1]} : vector<24x512xbf16> to vector<24x128xbf16>
    %cst_42 = arith.constant dense<0.000000e+00> : vector<24x128xf32>
    %122 = tpu.matmul %121, %8, %cst_42 {dimension_numbers = #tpu.dot_dimension_numbers<[1], [0], [0], [1], [0, 0, 1, 1], [], []>} : vector<24x128xbf16>, vector<128x128xbf16>, vector<24x128xf32> -> vector<24x128xf32>
    %123 = vector.extract_strided_slice %122 {offsets = [0, 0], sizes = [24, 64], strides = [1, 1]} : vector<24x128xf32> to vector<24x64xf32>
    %124 = vector.extract_strided_slice %122 {offsets = [0, 64], sizes = [24, 64], strides = [1, 1]} : vector<24x128xf32> to vector<24x64xf32>
    %125 = arith.maximumf %123, %124 : vector<24x64xf32>
    %126 = vector.extract_strided_slice %125 {offsets = [0, 0], sizes = [8, 32], strides = [1, 1]} : vector<24x64xf32> to vector<8x32xf32>
    %127 = vector.extract_strided_slice %125 {offsets = [0, 32], sizes = [8, 32], strides = [1, 1]} : vector<24x64xf32> to vector<8x32xf32>
    %128 = tpu.concatenate %126, %127 in 0 : vector<8x32xf32>, vector<8x32xf32> -> vector<16x32xf32>
    %129 = arith.truncf %128 : vector<16x32xf32> to vector<16x32xbf16>
    %130 = vector.extract_strided_slice %125 {offsets = [8, 0], sizes = [16, 32], strides = [1, 1]} : vector<24x64xf32> to vector<16x32xf32>
    %131 = vector.extract_strided_slice %125 {offsets = [8, 32], sizes = [16, 32], strides = [1, 1]} : vector<24x64xf32> to vector<16x32xf32>
    %132 = tpu.concatenate %130, %131 in 0 : vector<16x32xf32>, vector<16x32xf32> -> vector<32x32xf32>
    %133 = arith.truncf %132 : vector<32x32xf32> to vector<32x32xbf16>
    %134 = vector.extract_strided_slice %45 {offsets = [0, 256], sizes = [16, 128], strides = [1, 1]} : vector<16x512xbf16> to vector<16x128xbf16>
    %cst_43 = arith.constant dense<0.000000e+00> : vector<32x128xf32>
    %135 = tpu.matmul %129, %134, %cst_43 {dimension_numbers = #tpu.dot_dimension_numbers<[0], [0], [1], [1], [0, 1, 1, 1], [], []>} : vector<16x32xbf16>, vector<16x128xbf16>, vector<32x128xf32> -> vector<32x128xf32>
    %cst_44 = arith.constant dense<0xFF800000> : vector<128xf32>
    %136 = vector.multi_reduction <maximumf>, %135, %cst_44 [0] : vector<32x128xf32> to vector<128xf32>
    %137 = vector.shape_cast %136 : vector<128xf32> to vector<1x128xf32>
    %138 = vector.broadcast %137 : vector<1x128xf32> to vector<32x128xf32>
    %139 = arith.subf %135, %138 : vector<32x128xf32>
    %140 = math.exp %139 : vector<32x128xf32>
    %cst_45 = arith.constant dense<0.000000e+00> : vector<128xf32>
    %141 = vector.multi_reduction <add>, %140, %cst_45 [0] : vector<32x128xf32> to vector<128xf32>
    %142 = vector.shape_cast %141 : vector<128xf32> to vector<1x128xf32>
    %143 = tpu.reciprocal %142 {approx = true} : vector<1x128xf32> -> vector<1x128xf32>
    %144 = vector.broadcast %143 : vector<1x128xf32> to vector<32x128xf32>
    %145 = arith.mulf %140, %144 : vector<32x128xf32>
    %cst_46 = arith.constant dense<0.000000e+00> : vector<64x32xf32>
    %146 = tpu.matmul %6, %133, %cst_46 {dimension_numbers = #tpu.dot_dimension_numbers<[1], [0], [0], [1], [0, 0, 1, 1], [], []>} : vector<64x32xbf16>, vector<32x32xbf16>, vector<64x32xf32> -> vector<64x32xf32>
    %147 = arith.truncf %146 : vector<64x32xf32> to vector<64x32xbf16>
    %148 = arith.truncf %145 : vector<32x128xf32> to vector<32x128xbf16>
    %cst_47 = arith.constant dense<0.000000e+00> : vector<64x128xf32>
    %149 = tpu.matmul %147, %148, %cst_47 {dimension_numbers = #tpu.dot_dimension_numbers<[1], [0], [0], [1], [0, 0, 1, 1], [], []>} : vector<64x32xbf16>, vector<32x128xbf16>, vector<64x128xf32> -> vector<64x128xf32>
    %150 = vector.extract_strided_slice %41 {offsets = [0, 256], sizes = [64, 128], strides = [1, 1]} : vector<64x512xf32> to vector<64x128xf32>
    %cst_48 = arith.constant 2.000000e+00 : f32
    %151 = vector.broadcast %cst_48 : f32 to vector<64x128xf32>
    %152 = arith.mulf %151, %150 : vector<64x128xf32>
    %153 = vector.broadcast %9 : f32 to vector<64x128xf32>
    %154 = arith.mulf %153, %149 : vector<64x128xf32>
    %155 = arith.addf %152, %154 : vector<64x128xf32>
    %c0_49 = arith.constant 0 : index
    %c256 = arith.constant 256 : index
    %156 = vector.load %arg7[%c0_49, %c256] : memref<64x512xf32, #tpu.memory_space<vmem>>, vector<64x128xf32>
    tpu.vector_store %arg7[%c0_49, %c256], %155 {strides = array<i32>} : memref<64x512xf32, #tpu.memory_space<vmem>>, vector<64x128xf32>,
    %157 = vector.extract_strided_slice %48 {offsets = [0, 384], sizes = [24, 128], strides = [1, 1]} : vector<24x512xbf16> to vector<24x128xbf16>
    %cst_50 = arith.constant dense<0.000000e+00> : vector<24x128xf32>
    %158 = tpu.matmul %157, %8, %cst_50 {dimension_numbers = #tpu.dot_dimension_numbers<[1], [0], [0], [1], [0, 0, 1, 1], [], []>} : vector<24x128xbf16>, vector<128x128xbf16>, vector<24x128xf32> -> vector<24x128xf32>
    %159 = vector.extract_strided_slice %158 {offsets = [0, 0], sizes = [24, 64], strides = [1, 1]} : vector<24x128xf32> to vector<24x64xf32>
    %160 = vector.extract_strided_slice %158 {offsets = [0, 64], sizes = [24, 64], strides = [1, 1]} : vector<24x128xf32> to vector<24x64xf32>
    %161 = arith.maximumf %159, %160 : vector<24x64xf32>
    %162 = vector.extract_strided_slice %161 {offsets = [0, 0], sizes = [8, 32], strides = [1, 1]} : vector<24x64xf32> to vector<8x32xf32>
    %163 = vector.extract_strided_slice %161 {offsets = [0, 32], sizes = [8, 32], strides = [1, 1]} : vector<24x64xf32> to vector<8x32xf32>
    %164 = tpu.concatenate %162, %163 in 0 : vector<8x32xf32>, vector<8x32xf32> -> vector<16x32xf32>
    %165 = arith.truncf %164 : vector<16x32xf32> to vector<16x32xbf16>
    %166 = vector.extract_strided_slice %161 {offsets = [8, 0], sizes = [16, 32], strides = [1, 1]} : vector<24x64xf32> to vector<16x32xf32>
    %167 = vector.extract_strided_slice %161 {offsets = [8, 32], sizes = [16, 32], strides = [1, 1]} : vector<24x64xf32> to vector<16x32xf32>
    %168 = tpu.concatenate %166, %167 in 0 : vector<16x32xf32>, vector<16x32xf32> -> vector<32x32xf32>
    %169 = arith.truncf %168 : vector<32x32xf32> to vector<32x32xbf16>
    %170 = vector.extract_strided_slice %45 {offsets = [0, 384], sizes = [16, 128], strides = [1, 1]} : vector<16x512xbf16> to vector<16x128xbf16>
    %cst_51 = arith.constant dense<0.000000e+00> : vector<32x128xf32>
    %171 = tpu.matmul %165, %170, %cst_51 {dimension_numbers = #tpu.dot_dimension_numbers<[0], [0], [1], [1], [0, 1, 1, 1], [], []>} : vector<16x32xbf16>, vector<16x128xbf16>, vector<32x128xf32> -> vector<32x128xf32>
    %cst_52 = arith.constant dense<0xFF800000> : vector<128xf32>
    %172 = vector.multi_reduction <maximumf>, %171, %cst_52 [0] : vector<32x128xf32> to vector<128xf32>
    %173 = vector.shape_cast %172 : vector<128xf32> to vector<1x128xf32>
    %174 = vector.broadcast %173 : vector<1x128xf32> to vector<32x128xf32>
    %175 = arith.subf %171, %174 : vector<32x128xf32>
    %176 = math.exp %175 : vector<32x128xf32>
    %cst_53 = arith.constant dense<0.000000e+00> : vector<128xf32>
    %177 = vector.multi_reduction <add>, %176, %cst_53 [0] : vector<32x128xf32> to vector<128xf32>
    %178 = vector.shape_cast %177 : vector<128xf32> to vector<1x128xf32>
    %179 = tpu.reciprocal %178 {approx = true} : vector<1x128xf32> -> vector<1x128xf32>
    %180 = vector.broadcast %179 : vector<1x128xf32> to vector<32x128xf32>
    %181 = arith.mulf %176, %180 : vector<32x128xf32>
    %cst_54 = arith.constant dense<0.000000e+00> : vector<64x32xf32>
    %182 = tpu.matmul %6, %169, %cst_54 {dimension_numbers = #tpu.dot_dimension_numbers<[1], [0], [0], [1], [0, 0, 1, 1], [], []>} : vector<64x32xbf16>, vector<32x32xbf16>, vector<64x32xf32> -> vector<64x32xf32>
    %183 = arith.truncf %182 : vector<64x32xf32> to vector<64x32xbf16>
    %184 = arith.truncf %181 : vector<32x128xf32> to vector<32x128xbf16>
    %cst_55 = arith.constant dense<0.000000e+00> : vector<64x128xf32>
    %185 = tpu.matmul %183, %184, %cst_55 {dimension_numbers = #tpu.dot_dimension_numbers<[1], [0], [0], [1], [0, 0, 1, 1], [], []>} : vector<64x32xbf16>, vector<32x128xbf16>, vector<64x128xf32> -> vector<64x128xf32>
    %186 = vector.extract_strided_slice %41 {offsets = [0, 384], sizes = [64, 128], strides = [1, 1]} : vector<64x512xf32> to vector<64x128xf32>
    %cst_56 = arith.constant 2.000000e+00 : f32
    %187 = vector.broadcast %cst_56 : f32 to vector<64x128xf32>
    %188 = arith.mulf %187, %186 : vector<64x128xf32>
    %189 = vector.broadcast %9 : f32 to vector<64x128xf32>
    %190 = arith.mulf %189, %185 : vector<64x128xf32>
    %191 = arith.addf %188, %190 : vector<64x128xf32>
    %c0_57 = arith.constant 0 : index
    %c384 = arith.constant 384 : index
    %192 = vector.load %arg7[%c0_57, %c384] : memref<64x512xf32, #tpu.memory_space<vmem>>, vector<64x128xf32>
    tpu.vector_store %arg7[%c0_57, %c384], %191 {strides = array<i32>} : memref<64x512xf32, #tpu.memory_space<vmem>>, vector<64x128xf32>,
    return
  }
  func.func @transform_0(%arg0: i32) -> (i32, i32) {
    %c0_i32 = arith.constant 0 : i32
    %c0_i32_0 = arith.constant 0 : i32
    return %arg0, %c0_i32 : i32, i32
  }
  func.func @transform_1(%arg0: i32) -> (i32, i32) {
    %c0_i32 = arith.constant 0 : i32
    %c0_i32_0 = arith.constant 0 : i32
    %c0_i32_1 = arith.constant 0 : i32
    return %c0_i32, %c0_i32_0 : i32, i32
  }
  func.func @transform_2(%arg0: i32) -> (i32, i32) {
    %c0_i32 = arith.constant 0 : i32
    %c0_i32_0 = arith.constant 0 : i32
    %c0_i32_1 = arith.constant 0 : i32
    return %c0_i32, %c0_i32_0 : i32, i32
  }
  func.func @transform_3(%arg0: i32) -> (i32, i32) {
    %c0_i32 = arith.constant 0 : i32
    %c0_i32_0 = arith.constant 0 : i32
    %c0_i32_1 = arith.constant 0 : i32
    return %c0_i32, %c0_i32_0 : i32, i32
  }
  func.func @transform_4(%arg0: i32) -> (i32, i32) {
    %c0_i32 = arith.constant 0 : i32
    %c0_i32_0 = arith.constant 0 : i32
    %c0_i32_1 = arith.constant 0 : i32
    return %c0_i32, %c0_i32_0 : i32, i32
  }
  func.func @transform_5(%arg0: i32) -> (i32, i32) {
    %c0_i32 = arith.constant 0 : i32
    %c0_i32_0 = arith.constant 0 : i32
    %c0_i32_1 = arith.constant 0 : i32
    return %c0_i32, %c0_i32_0 : i32, i32
  }
  func.func @transform_6(%arg0: i32) -> (i32, i32) {
    %c0_i32 = arith.constant 0 : i32
    %c0_i32_0 = arith.constant 0 : i32
    return %arg0, %c0_i32 : i32, i32
  }
}

</mosaic_0001>

<bundles_post_ra>
// kernel: tpu_custom_call.1
= control target key start
LH: loop header
LB: loop body
LE: loop exit
PB: predicated region body
PF: predicated region fallthrough
CT: control target
= control target key end

     0   :  { %s4780_s0 = inlined_call_operand.hbm [shape: f32[128,512], index: 0, kind: input, shape index: {}]   ;;  %s4781_s1 = inlined_call_operand.vmem [shape: bf16[96,64], index: 1, kind: input, shape index: {}]   ;;  %s4782_s2 = inlined_call_operand.vmem [shape: bf16[192,32], index: 2, kind: input, shape index: {}]   ;;  %s4783_s3 = inlined_call_operand.vmem [shape: bf16[128,128], index: 3, kind: input, shape index: {}]   ;;  %s4784_s4 = inlined_call_operand.vmem [shape: f32[64,4], index: 4, kind: input, shape index: {}]   ;;  %s4785_s5 = inlined_call_operand.<no memory space> [shape: f32[1,1], index: 5, kind: input, shape index: {}]   ;;  %s4786_s6 = inlined_call_operand.hbm [shape: f32[128,512], index: 6, kind: output, shape index: {}]  }
   0x1   :  { %11 = sst [smem:[#allocation2]] %s4785_s5 }
   0x2   :  { %12 = vsyncpa [#allocation4], 0 }
   0x3   :  { %14 = vsyncpa [#allocation4 + $0x1], 0 }
   0x4   :  { %15 = vsyncpa [#allocation5], 0 }
   0x5   :  { %17 = vsyncpa [#allocation5 + $0x1], 0  ;;  %s3745_s23 = smov 0   ;;  %s3747_s24 = smov 0  }
   0x6   :  { %s3749_s25 = smov 0   ;;  %s3751_s26 = smov 0  }
   0x7 LB: > { %s3766_s5 = sadd.s32 4294967295, %s3693_s26   ;;  %s3007_s27 = sadd.s32 4294967294, %s3693_s26   ;;  %s3693_s26 = sphi %s3751_s26, %s4872_s26   ;;  %s3689_s25 = sphi %s3749_s25, %s4871_s25   ;;  %s3685_s24 = sphi %s3747_s24, %s4870_s24   ;;  %s3681_s23 = sphi %s3745_s23, %s4869_s23  }
   0x8   : > { %s3770_s28 = sadd.s32 1, %s3693_s26   ;;  %s30_s29 = sadd.s32 1, %s3689_s25 }
   0x9   : > { %s27_s30 = ssub.s32 %s3693_s26, %s3770_s28  ;;  %p37_p0 = scmp.ne.s32.totalorder %s3689_s25, %s3685_s24 }
   0xa   : > { %p28_p1 = scmp.eq.s32.totalorder %s27_s30, 0  ;;  %p38_p2 = scmp.eq.s32.totalorder %s3693_s26, 0 }
   0xb   : > { %p43_p3 = scmp.ne.s32.totalorder %s3685_s24, %s3681_s23  ;;  %p44_p4 = scmp.eq.s32.totalorder %s3766_s5, 0 }
   0xc   : > { %s3782_s7 = scalar_select %p28_p1, %s3689_s25, %s30_s29  }
   0xd   : > { %p3784_p5 = por %p38_p2, %p37_p0  ;;  %p3788_p6 = por %p44_p4, %p43_p3 }
   0xe   : > { %p172_p7 = scmp.eq.s32.totalorder %s3766_s5, 1  ;;  %p178_p8 = scmp.eq.s32.totalorder %s3007_s27, 1 }
   0xf   : > { %p3437_p10 = scmp.lt.s32.totalorder %s3693_s26, 2  ;;  %s213_s12 = sand.u32 1, %s3689_s25  }
  0x10   : > { %p3795_p11 = por %p172_p7, %p37_p0  ;;  %p3799_p12 = por %p178_p8, %p43_p3 }
  0x11   : > { %s3118_s13 = sshll.u32 %s3693_s26, 12  ;;  %s3010_s14 = sshll.u32 %s213_s12, 8 }
  0x12   : > { %s4812_s10 = scalar_select %p3795_p11, 1, 0 }
  0x13   : > { %s4813_s11 = scalar_select %p3799_p12, 1, 0 }
  0x14   : > { %s3808_s17 = scalar_lea.hbm %s4780_s0, %s3118_s13  ;;  %s217_s18 = scalar_lea.vmem [#allocation3], %s3010_s14 }
  0x15   : > { %s225_s19 = sshll.u32 %s217_s18, 4  ;;  %p3812_p13 = pnand %p3437_p10, %p3784_p5  ;;  %s3816_s19 = int_to_ptr.vmem [resolvable:$true] %s225_s19 }
  0x16   : > { %s3818_s21 = scalar_lea.sflag [#allocation4], %s213_s12  ;;  %s3597_s22 = scalar_lea.hbm %s3808_s17, 4096 }
  0x17   : > { %p3598_p0 = scmp.ne.s32.totalorder %s3808_s17, %s3597_s22  ;;  %p3599_p1 = pneg %p3812_p13 }
  0x18   : > { %s3602_s30 = scalar_lea.hbm %s4780_s0, 8192  ;;  %p3603_p4 = scmp.lt.u32.totalorder %s3808_s17, %s4780_s0 }
  0x19   : > { %p3600_p2 = pnand %p3599_p1, %p3598_p0  ;;  %p3604_p5 = scmp.lt.u32.totalorder %s3602_s30, %s3597_s22 }
  0x1a   : > { %p3606_p8 = scmp.lt.u32.totalorder %s3597_s22, %s3808_s17 }
  0x1b   : > { %p3601_p3 = pneg %p3600_p2  ;;  %p3605_p7 = por %p3604_p5, %p3603_p4 }
  0x1d   : > { %p3607_p10 = por %p3606_p8, %p3605_p7 }
  0x1f   : > { %p3608_p9 = pnand %p3607_p10, %p3601_p3 }
  0x21   : > { %3611 = shalt.err (!%p3608_p9)
}
  0x22   : > { %s3612_s12 = scalar_lea.vmem %s3816_s19, 4096  ;;  %s3695_s14 = smov [#allocation3]  }
  0x23   : > { %p3613_p0 = scmp.ne.s32.totalorder %s3816_s19, %s3612_s12  ;;  %s3617_s15 = sshll.u32 %s3695_s14, 4  ;;  %s3618_s15 = int_to_ptr.vmem [resolvable:$false] %s3617_s15 }
  0x24   : > { %s3619_s16 = scalar_lea.vmem %s3618_s15, 8192  ;;  %p3620_p11 = scmp.lt.s32.totalorder %s3816_s19, %s3618_s15 }
  0x25   : > { %p3615_p2 = pnand %p3613_p0, %p3599_p1  ;;  %p3621_p4 = scmp.lt.s32.totalorder %s3619_s16, %s3612_s12 }
  0x27   : > { %p3616_p12 = pneg %p3615_p2  ;;  %p3622_p5 = por %p3621_p4, %p3620_p11 }
  0x29   : > { %p3623_p7 = pnand %p3622_p5, %p3616_p12 }
  0x2b   : > { %3626 = shalt.err (!%p3623_p7)
}
  0x2c   : > { %s3696_s18 = smov 512   ;;  %s3697_s22 = smov 32  }
  0x2d   : > { %3432 = dma.hbm_to_vmem [thread:$0]  (!%p3812_p13), %s3808_s17, 4096, %s3816_s19, %s3818_s21, %s3696_s18, %s3696_s18, %s3697_s22  }
  0x2e   : > { %p3014_p9 = scmp.ge.s32.totalorder %s3693_s26, 1  ;;  %p233_p1 = scmp.lt.s32.totalorder %s3693_s26, 3 }
  0x30   : > { %p234_p3 = pnand %p3014_p9, %p233_p1 }
  0x32   : > { %237 = sbr.rel (%p234_p3) target bundleno = 4038 (0xfc6), region = 44 }
  0x39   : > { %s3849_s27 = sand.u32 1, %s3685_s24  }
  0x3a   : > { %s3015_s29 = sshll.u32 %s3849_s27, 8  ;;  %s240_s30 = scalar_lea.sflag [#allocation4], %s3849_s27 }
  0x3b   : > { %s3855_s8 = scalar_lea.vmem [#allocation3], %s3015_s29 }
  0x3c   : > { %3672 = dma.done.wait (%p3788_p6), %s240_s30, 4096  }
  0x3d   : > { %3674 = vsyncadd (%p3788_p6), %s240_s30, 4294963200  ;;  %v3698_v0 = vmov 0   ;;  %v3865_v1 = vld [vmem:[%s3855_s8 + $0x8] sm:$0xff]  ;;  %v3871_v3 = vld [vmem:[%s3855_s8 + $0x18] sm:$0xff]  ;;  %vm394_vm0 = vcmask 523264   ;;  %v3699_v57 = vmov 1  }
  0x3e   : > { %433 = vmatprep.mubr.bf16.mxu0 %v3698_v0  ;;  %486 = vmatprep.mubr.bf16.mxu1 %v3698_v0  ;;  %v3868_v2 = vld [vmem:[%s3855_s8 + $0x28] sm:$0xff]  ;;  %v3876_v5 = vld [vmem:[%s3855_s8 + $0x38] sm:$0xff]  ;;  %v3879_v6 = vld [vmem:[%s3855_s8] sm:$0xff]  ;;  %vm553_vm1 = vcmask 261120   ;;  %vm1352_vm2 = vcmask 1043456   ;;  %s3702_s21 = smov 64  }
  0x3f   : > { %3481 = vset.pattern.permute.xlu0 %v3698_v0  ;;  %v369_v4 = vpack.c.bf16 %v3868_v2, %v3865_v1  ;;  %v3882_v7 = vld [vmem:[%s3855_s8 + $0x20] sm:$0xff]  ;;  %v371_v8 = vpack.c.bf16 %v3876_v5, %v3871_v3  ;;  %v3889_v10 = vld [vmem:[%s3855_s8 + $0x10] sm:$0xff]  ;;  %v3895_v12 = vld [vmem:[%s3855_s8 + $0x48] sm:$0xff]  ;;  %3482 = vset.pattern.permute.xlu1 %v3699_v57  ;;  %s3703_s14 = smov 96   ;;  %vm1523_vm3 = vcmask 130048   ;;  %s367_s9 = sld [smem:[#allocation2]] }
  0x40   : > { %v368_v9 = vpack.c.bf16 %v3882_v7, %v3879_v6  ;;  %v3892_v11 = vld [vmem:[%s3855_s8 + $0x30] sm:$0xff]  ;;  %v3900_v14 = vld [vmem:[%s3855_s8 + $0x68] sm:$0xff]  ;;  %v3903_v15 = vld [vmem:[%s3855_s8 + $0x58] sm:$0xff]  ;;  %s4551_s17 = scalar_lea.vmem [#allocation6], %s3015_s29  ;;  %s3120_s16 = sshll.u32 %s3766_s5, 12 }
  0x41   : > { %401 = vmatprep.subr.bf16.mxu0 %v369_v4  ;;  %v370_v13 = vpack.c.bf16 %v3892_v11, %v3889_v10  ;;  %v3906_v16 = vld [vmem:[%s3855_s8 + $0x78] sm:$0xff]  ;;  %454 = vmatprep.subr.bf16.mxu1 %v371_v8  ;;  %v373_v17 = vpack.c.bf16 %v3900_v14, %v3895_v12  ;;  %v3913_v19 = vld [vmem:[%s3855_s8 + $0x40] sm:$0xff]  ;;  %v3919_v21 = vld [vmem:[%s3855_s8 + $0x50] sm:$0xff]  ;;  %s2934_s18 = sshll.u32 %s4551_s17, 4  ;;  %s4731_s5 = scalar_lea.hbm %s4786_s6, %s3120_s16  ;;  %s4733_s18 = int_to_ptr.vmem [resolvable:$true] %s2934_s18 }
  0x42   : > { %402 = vmatpush1.bf16.msra.mxu0 %v368_v9  ;;  %v375_v18 = vpack.c.bf16 %v3906_v16, %v3903_v15  ;;  %v3916_v20 = vld [vmem:[%s3855_s8 + $0x60] sm:$0xff]  ;;  %v3924_v23 = vld [vmem:[%s3855_s8 + $0x70] sm:$0xff]  ;;  %v3927_v24 = vld [vmem:[%s3855_s8 + $0x88] sm:$0xff]  ;;  %p4866_p11 = scmp.ne.s32.totalorder %s4812_s10, 0  ;;  %s3704_s29 = smov [#allocation6]  }
  0x43   : > { %455 = vmatpush1.bf16.msra.mxu1 %v370_v13  ;;  %v372_v22 = vpack.c.bf16 %v3916_v20, %v3913_v19  ;;  %v3930_v25 = vld [vmem:[%s3855_s8 + $0xa8] sm:$0xff]  ;;  %403 = vmatprep.subr.bf16.mxu0 %v373_v17  ;;  %v374_v26 = vpack.c.bf16 %v3924_v23, %v3919_v21  ;;  %v3937_v28 = vld [vmem:[%s3855_s8 + $0x98] sm:$0xff]  ;;  %v3943_v30 = vld [vmem:[%s3855_s8 + $0x80] sm:$0xff]  ;;  %s3631_s19 = sshll.u32 %s3704_s29, 4  ;;  %s3632_s19 = int_to_ptr.vmem [resolvable:$false] %s3631_s19 }
  0x44   : > { %456 = vmatprep.subr.bf16.mxu1 %v375_v18  ;;  %v377_v27 = vpack.c.bf16 %v3930_v25, %v3927_v24  ;;  %v3940_v29 = vld [vmem:[%s3855_s8 + $0xb8] sm:$0xff]  ;;  %v3948_v32 = vld [vmem:[%s3855_s8 + $0xa0] sm:$0xff]  ;;  %v3951_v33 = vld [vmem:[%s3855_s8 + $0x90] sm:$0xff]  ;;  %s3633_s20 = scalar_lea.vmem %s3632_s19, 8192  ;;  %p3634_p8 = scmp.lt.s32.totalorder %s4733_s18, %s3632_s19 }
  0x45   : > { %v379_v31 = vpack.c.bf16 %v3940_v29, %v3937_v28  ;;  %v3954_v34 = vld [vmem:[%s3855_s8 + $0xb0] sm:$0xff]  ;;  %v376_v35 = vpack.c.bf16 %v3948_v32, %v3943_v30  ;;  %v3959_v36 = vld [vmem:[%s3855_s8 + $0xc8] sm:$0xff]  ;;  %v3965_v38 = vld [vmem:[%s3855_s8 + $0xd8] sm:$0xff] }
  0x46   : > { %404 = vmatpush1.bf16.msra.mxu0 %v372_v22  ;;  %v3962_v37 = vld [vmem:[%s3855_s8 + $0xe8] sm:$0xff]  ;;  %v378_v39 = vpack.c.bf16 %v3954_v34, %v3951_v33  ;;  %v3972_v41 = vld [vmem:[%s3855_s8 + $0xf8] sm:$0xff]  ;;  %v3975_v42 = vld [vmem:[%s3855_s8 + $0xc0] sm:$0xff] }
  0x47   : > { %457 = vmatpush1.bf16.msra.mxu1 %v374_v26  ;;  %405 = vmatprep.subr.bf16.mxu0 %v377_v27  ;;  %v381_v40 = vpack.c.bf16 %v3962_v37, %v3959_v36  ;;  %v3978_v43 = vld [vmem:[%s3855_s8 + $0xe0] sm:$0xff]  ;;  %v383_v44 = vpack.c.bf16 %v3972_v41, %v3965_v38  ;;  %v3983_v45 = vld [vmem:[%s3855_s8 + $0xd0] sm:$0xff]  ;;  %v4003_v51 = vld [vmem:[%s4784_s4 + $0x8] sm:$0xff] }
  0x48   : > { %458 = vmatprep.subr.bf16.mxu1 %v379_v31  ;;  %v3986_v46 = vld [vmem:[%s3855_s8 + $0xf0] sm:$0xff]  ;;  %v380_v47 = vpack.c.bf16 %v3978_v43, %v3975_v42  ;;  %v3993_v48 = vld [vmem:[%s4784_s4] sm:$0xff]  ;;  %v4013_v53 = vld [vmem:[%s4784_s4 + $0x18] sm:$0xff]  ;;  %s2920_s8 = scalar_lea.sflag [#allocation5], %s3849_s27 }
  0x49   : > { %v382_v49 = vpack.c.bf16 %v3986_v46, %v3983_v45  ;;  %v3527_v50 = vld [vmem:[%s4781_s1] sm:$0xff]   ;;  %v4008_v52 = vld [vmem:[%s4784_s4 + $0x10] sm:$0xff]  ;;  %v4017_v54 = vpack.c.bf16 %v4003_v51, %v3993_v48  ;;  %v3528_v56 = vld [vmem:[%s4781_s1 + $0x8] sm:$0xff]  }
  0x4a   : > { %406 = vmatpush1.bf16.msra.mxu0 %v376_v35  ;;  %v4022_v55 = vpack.c.bf16 %v4013_v53, %v4008_v52 }
  0x4b   : > { %459 = vmatpush1.bf16.msra.mxu1 %v378_v39  ;;  %407 = vmatprep.subr.bf16.mxu0 %v381_v40 }
  0x4c   : > { %460 = vmatprep.subr.bf16.mxu1 %v383_v44  ;;  %519 = vperm.xlu0 %3481, %v4017_v54  }
  0x4d   : > { %675 = vperm.xlu1 %3482, %v4017_v54  }
  0x4e   : > { %408 = vmatpush1.bf16.msra.mxu0 %v380_v47 }
  0x4f   : > { %461 = vmatpush1.bf16.msra.mxu1 %v382_v49 }
  0x50   : > { %524 = vperm.xlu0 %3481, %v4022_v55  }
  0x51   : > { %3019 = vmatmul.mubr.msk.bf16.vlgmr.msra.gmra.mrb[0].mxu0 %vm394_vm0, %v3527_v50  ;;  %679 = vperm.xlu1 %3482, %v4022_v55  }
  0x52   : > { %3021 = vmatmul.mubr.msk.bf16.vlgmr.msra.gmra.mrb[0].mxu1 %vm394_vm0, %v3527_v50  ;;  %443 = vmatprep.mubr.bf16.mxu0 %v3698_v0 }
  0x53   : > { %496 = vmatprep.mubr.bf16.mxu1 %v3698_v0 }
  0x59   : > { %3020 = vmatmul.mubr.msk.bf16.gmra.mrb[4].mxu0 %vm394_vm0, %v3528_v56 }
  0x5a   : > { %3022 = vmatmul.mubr.msk.bf16.gmra.mrb[4].mxu1 %vm394_vm0, %v3528_v56  ;;  %592 = vmatprep.mubr.bf16.mxu0 %v3698_v0 }
  0x5b   : > { %602 = vmatprep.mubr.bf16.mxu1 %v3698_v0 }
  0xcb   : > { %v520_v59 = vpop.permute.xlu0 %519 }
 0x124   : > { %v435_v58 = vpop.f32.mrb[0].mxu0 }
 0x125   : > { %v488_v60 = vpop.f32.mrb[0].mxu1  ;;  %v437_v61 = vpop.f32.mrb[1].mxu0 }
 0x126   : > { %v490_v62 = vpop.f32.mrb[1].mxu1  ;;  %v439_v63 = vpop.f32.mrb[2].mxu0 }
 0x127   : > { %v507_v4 = vpack.c.bf16 %v439_v63, %v435_v58  ;;  %v492_v8 = vpop.f32.mrb[2].mxu1  ;;  %v441_v9 = vpop.f32.mrb[3].mxu0 }
 0x128   : > { %v509_v13 = vpack.c.bf16 %v492_v8, %v488_v60  ;;  %v508_v17 = vpack.c.bf16 %v441_v9, %v437_v61  ;;  %v494_v18 = vpop.f32.mrb[3].mxu1  ;;  %v525_v58 = vpop.permute.xlu0 %524 }
 0x129   : > { %v527_v22 = vadd.bf16 %v520_v59, %v507_v4  ;;  %v510_v26 = vpack.c.bf16 %v494_v18, %v490_v62 }
 0x12a   : > { %v528_v27 = vadd.bf16 %v520_v59, %v508_v17  ;;  %v529_v18 = vadd.bf16 %v520_v59, %v509_v13 }
 0x12b   : > { %v535_v39 = vmax.bf16 %v3698_v0, %v527_v22  ;;  %v530_v8 = vadd.bf16 %v520_v59, %v510_v26 }
 0x12c   : > { %v445_v31 = vpop.f32.mrb[4].mxu0  ;;  %v536_v35 = vmax.bf16 %v3698_v0, %v528_v27  ;;  %v537_v59 = vmax.bf16 %v3698_v0, %v529_v18 }
 0x12d   : > { %v498_v40 = vpop.f32.mrb[4].mxu1  ;;  %v447_v44 = vpop.f32.mrb[5].mxu0 }
 0x12e   : > { %v500_v47 = vpop.f32.mrb[5].mxu1  ;;  %v449_v49 = vpop.f32.mrb[6].mxu0  ;;  %560 = vmatprep.subr.bf16.mxu0 %v536_v35  ;;  %3421 = vmatprep.subr.bf16.mxu1 %v536_v35  ;;  %v3529_v35 = vld [vmem:[%s4782_s2] sm:$0xff]  }
 0x12f   : > { %v511_v50 = vpack.c.bf16 %v449_v49, %v445_v31  ;;  %v502_v56 = vpop.f32.mrb[6].mxu1  ;;  %v451_v57 = vpop.f32.mrb[7].mxu0  ;;  %561 = vmatpush1.bf16.msra.mxu0 %v535_v39  ;;  %3423 = vmatpush1.bf16.msra.mxu1 %v535_v39  ;;  %v538_v31 = vmax.bf16 %v3698_v0, %v530_v8  ;;  %v3530_v39 = vld [vmem:[%s4782_s2 + $0x8] sm:$0xff]  }
 0x130   : > { %v513_v60 = vpack.c.bf16 %v502_v56, %v498_v40  ;;  %v512_v61 = vpack.c.bf16 %v451_v57, %v447_v44  ;;  %v504_v62 = vpop.f32.mrb[7].mxu1  ;;  %v3700_v44 = vmov 2  }
 0x131   : > { %v531_v63 = vadd.bf16 %v525_v58, %v511_v50  ;;  %v514_v4 = vpack.c.bf16 %v504_v62, %v500_v47  ;;  %3483 = vset.pattern.permute.xlu0 %v3700_v44  ;;  %3484 = vset.pattern.permute.xlu1 %v3700_v44  ;;  %v676_v47 = vpop.permute.xlu1 %675 }
 0x132   : > { %v532_v9 = vadd.bf16 %v525_v58, %v512_v61  ;;  %v533_v13 = vadd.bf16 %v525_v58, %v513_v60  ;;  %829 = vperm.xlu0 %3483, %v4017_v54   ;;  %833 = vperm.xlu1 %3484, %v4022_v55  }
 0x133   : > { %v539_v22 = vmax.bf16 %v3698_v0, %v531_v63  ;;  %v534_v27 = vadd.bf16 %v525_v58, %v514_v4 }
 0x134   : > { %v540_v17 = vmax.bf16 %v3698_v0, %v532_v9  ;;  %v541_v40 = vmax.bf16 %v3698_v0, %v533_v13 }
 0x135   : > { %v542_v26 = vmax.bf16 %v3698_v0, %v534_v27  ;;  %v680_v49 = vpop.permute.xlu1 %679 }
 0x136   : > { %562 = vmatprep.subr.bf16.mxu0 %v540_v17  ;;  %3422 = vmatprep.subr.bf16.mxu1 %v540_v17 }
 0x137   : > { %563 = vmatpush1.bf16.msra.mxu0 %v539_v22  ;;  %3424 = vmatpush1.bf16.msra.mxu1 %v539_v22 }
 0x138   : > { %613 = vmatprep.subr.bf16.mxu1 %v538_v31 }
 0x13a   : > { %3025 = vmatmul.mubr.msk.bf16.vlgmr.msra.gmra.mrb[8].mxu0 %vm553_vm1, %v3529_v35  ;;  %3026 = vmatmul.mubr.msk.bf16.vlgmr.msra.gmra.mrb[8].mxu1 %vm553_vm1, %v3530_v39 }
 0x13b   : > { %614 = vmatpush1.bf16.msra.mxu1 %v537_v59  ;;  %645 = vmatprep.mubr.bf16.mxu1 %v3698_v0 }
 0x13c   : > { %615 = vmatprep.subr.bf16.mxu1 %v542_v26  ;;  %746 = vmatprep.mubr.bf16.mxu0 %v3698_v0 }
 0x13f   : > { %616 = vmatpush1.bf16.msra.mxu1 %v541_v40 }
 0x142   : > { %3027 = vmatmul.mubr.msk.bf16.vlgmr.msra.gmra.mrb[12].mxu1 %vm553_vm1, %v3529_v35 }
 0x143   : > { %655 = vmatprep.mubr.bf16.mxu1 %v3698_v0 }
 0x14a   : > { %3028 = vmatmul.mubr.msk.bf16.gmra.mrb[16].mxu1 %vm553_vm1, %v3530_v39 }
 0x14b   : > { %799 = vmatprep.mubr.bf16.mxu1 %v3698_v0 }
 0x20d   : > { %v594_v50 = vpop.f32.mrb[8].mxu0  ;;  %v604_v56 = vpop.f32.mrb[8].mxu1 }
 0x20e   : > { %v596_v57 = vpop.f32.mrb[9].mxu0  ;;  %v606_v58 = vpop.f32.mrb[9].mxu1 }
 0x20f   : > { %v598_v60 = vpop.f32.mrb[10].mxu0  ;;  %v608_v61 = vpop.f32.mrb[10].mxu1 }
 0x210   : > { %v666_v62 = vpack.c.bf16 %v598_v60, %v594_v50  ;;  %v670_v63 = vpack.c.bf16 %v608_v61, %v604_v56  ;;  %v600_v4 = vpop.f32.mrb[11].mxu0  ;;  %v610_v8 = vpop.f32.mrb[11].mxu1 }
 0x211   : > { %v667_v9 = vpack.c.bf16 %v600_v4, %v596_v57  ;;  %v671_v17 = vpack.c.bf16 %v610_v8, %v606_v58  ;;  %v3531_v58 = vld [vmem:[%s4782_s2 + $0x10] sm:$0xff]  }
 0x212   : > { %v682_v18 = vadd.bf16 %v676_v47, %v666_v62  ;;  %v686_v35 = vadd.bf16 %v680_v49, %v670_v63 }
 0x213   : > { %v683_v22 = vadd.bf16 %v676_v47, %v667_v9  ;;  %v687_v27 = vadd.bf16 %v680_v49, %v671_v17 }
 0x214   : > { %v690_v31 = vmax.bf16 %v3698_v0, %v682_v18  ;;  %v694_v56 = vmax.bf16 %v3698_v0, %v686_v35 }
 0x215   : > { %v647_v54 = vpop.f32.mrb[12].mxu1  ;;  %v691_v55 = vmax.bf16 %v3698_v0, %v683_v22  ;;  %v695_v13 = vmax.bf16 %v3698_v0, %v687_v27  ;;  %v3532_v22 = vld [vmem:[%s4782_s2 + $0x18] sm:$0xff]  }
 0x216   : > { %v649_v39 = vpop.f32.mrb[13].mxu1 }
 0x217   : > { %v651_v59 = vpop.f32.mrb[14].mxu1  ;;  %714 = vmatprep.subr.bf16.mxu0 %v691_v55  ;;  %v347_v55 = vld [vmem:[%s4784_s4 + $0x20] sm:$0xff] }
 0x218   : > { %v668_v26 = vpack.c.bf16 %v651_v59, %v647_v54  ;;  %v653_v40 = vpop.f32.mrb[15].mxu1  ;;  %715 = vmatpush1.bf16.msra.mxu0 %v690_v31  ;;  %v349_v31 = vld [vmem:[%s4784_s4 + $0x30] sm:$0xff]  ;;  %v830_v59 = vpop.permute.xlu0 %829 }
 0x219   : > { %v669_v44 = vpack.c.bf16 %v653_v40, %v649_v39  ;;  %716 = vmatprep.subr.bf16.mxu0 %v695_v13 }
 0x21a   : > { %v684_v50 = vadd.bf16 %v676_v47, %v668_v26 }
 0x21b   : > { %v685_v57 = vadd.bf16 %v676_v47, %v669_v44 }
 0x21c   : > { %717 = vmatpush1.bf16.msra.mxu0 %v694_v56  ;;  %v692_v62 = vmax.bf16 %v3698_v0, %v684_v50 }
 0x21d   : > { %v657_v60 = vpop.f32.mrb[16].mxu1  ;;  %v693_v61 = vmax.bf16 %v3698_v0, %v685_v57 }
 0x21e   : > { %v659_v63 = vpop.f32.mrb[17].mxu1 }
 0x21f   : > { %v661_v4 = vpop.f32.mrb[18].mxu1  ;;  %3031 = vmatmul.mubr.msk.bf16.vlgmr.msra.gmra.mrb[12].mxu0 %vm553_vm1, %v3531_v58  ;;  %767 = vmatprep.subr.bf16.mxu1 %v693_v61  ;;  %v834_v61 = vpop.permute.xlu1 %833 }
 0x220   : > { %v672_v8 = vpack.c.bf16 %v661_v4, %v657_v60  ;;  %v663_v9 = vpop.f32.mrb[19].mxu1  ;;  %768 = vmatpush1.bf16.msra.mxu1 %v692_v62  ;;  %756 = vmatprep.mubr.bf16.mxu0 %v3698_v0 }
 0x221   : > { %v673_v47 = vpack.c.bf16 %v663_v9, %v659_v63 }
 0x222   : > { %v688_v17 = vadd.bf16 %v680_v49, %v672_v8 }
 0x223   : > { %v689_v18 = vadd.bf16 %v680_v49, %v673_v47  ;;  %v3701_v49 = vmov 3  }
 0x224   : > { %v696_v54 = vmax.bf16 %v3698_v0, %v688_v17  ;;  %3485 = vset.pattern.permute.xlu1 %v3701_v49  ;;  %3486 = vset.pattern.permute.xlu0 %v3701_v49 }
 0x225   : > { %v697_v27 = vmax.bf16 %v3698_v0, %v689_v18  ;;  %854 = vperm.xlu1 %3485, %v3993_v48   ;;  %859 = vperm.xlu0 %3486, %v4003_v51   ;;  %v348_v48 = vld [vmem:[%s4784_s4 + $0x28] sm:$0xff]  ;;  %v350_v51 = vld [vmem:[%s4784_s4 + $0x38] sm:$0xff] }
 0x227   : > { %3032 = vmatmul.mubr.msk.bf16.gmra.mrb[16].mxu0 %vm553_vm1, %v3532_v22  ;;  %769 = vmatprep.subr.bf16.mxu1 %v697_v27 }
 0x228   : > { %770 = vmatpush1.bf16.msra.mxu1 %v696_v54  ;;  %956 = vmatprep.mubr.bf16.mxu0 %v3698_v0 }
 0x229   : > { %864 = vperm.xlu1 %3485, %v4008_v52   ;;  %874 = vperm.xlu0 %3486, %v347_v55  }
 0x22b   : > { %3033 = vmatmul.mubr.msk.bf16.vlgmr.msra.gmra.mrb[20].mxu1 %vm553_vm1, %v3531_v58 }
 0x22c   : > { %809 = vmatprep.mubr.bf16.mxu1 %v3698_v0 }
 0x22d   : > { %869 = vperm.xlu1 %3485, %v4013_v53   ;;  %884 = vperm.xlu0 %3486, %v349_v31  }
 0x231   : > { %879 = vperm.xlu1 %3485, %v348_v48  }
 0x233   : > { %3034 = vmatmul.mubr.msk.bf16.gmra.mrb[24].mxu1 %vm553_vm1, %v3532_v22 }
 0x234   : > { %1029 = vmatprep.mubr.bf16.mxu1 %v3698_v0 }
 0x235   : > { %889 = vperm.xlu1 %3485, %v350_v51   ;;  %v3533_v51 = vld [vmem:[%s4782_s2 + $0x20] sm:$0xff]  }
 0x2f2   : > { %v748_v35 = vpop.f32.mrb[12].mxu0 }
 0x2f3   : > { %v750_v52 = vpop.f32.mrb[13].mxu0 }
 0x2f4   : > { %v752_v39 = vpop.f32.mrb[14].mxu0 }
 0x2f5   : > { %v820_v13 = vpack.c.bf16 %v752_v39, %v748_v35  ;;  %v754_v26 = vpop.f32.mrb[15].mxu0 }
 0x2f6   : > { %v821_v40 = vpack.c.bf16 %v754_v26, %v750_v52 }
 0x2f7   : > { %v836_v44 = vadd.bf16 %v830_v59, %v820_v13 }
 0x2f8   : > { %v837_v53 = vadd.bf16 %v830_v59, %v821_v40 }
 0x2f9   : > { %v844_v58 = vmax.bf16 %v3698_v0, %v836_v44 }
 0x2fa   : > { %v758_v50 = vpop.f32.mrb[16].mxu0  ;;  %v845_v56 = vmax.bf16 %v3698_v0, %v837_v53 }
 0x2fb   : > { %v760_v57 = vpop.f32.mrb[17].mxu0 }
 0x2fc   : > { %v762_v60 = vpop.f32.mrb[18].mxu0  ;;  %924 = vmatprep.subr.bf16.mxu0 %v845_v56  ;;  %v3534_v56 = vld [vmem:[%s4782_s2 + $0x28] sm:$0xff]  }
 0x2fd   : > { %v824_v62 = vpack.c.bf16 %v762_v60, %v758_v50  ;;  %v764_v63 = vpop.f32.mrb[19].mxu0  ;;  %925 = vmatpush1.bf16.msra.mxu0 %v844_v58  ;;  %v3535_v60 = vld [vmem:[%s4782_s2 + $0x30] sm:$0xff]  }
 0x2fe   : > { %v825_v4 = vpack.c.bf16 %v764_v63, %v760_v57  ;;  %v801_v8 = vpop.f32.mrb[20].mxu1  ;;  %v860_v63 = vpop.permute.xlu0 %859 }
 0x2ff   : > { %v840_v9 = vadd.bf16 %v834_v61, %v824_v62  ;;  %v803_v47 = vpop.f32.mrb[21].mxu1  ;;  %v855_v62 = vpop.permute.xlu1 %854 }
 0x300   : > { %v841_v17 = vadd.bf16 %v834_v61, %v825_v4  ;;  %v805_v18 = vpop.f32.mrb[22].mxu1 }
 0x301   : > { %v822_v22 = vpack.c.bf16 %v805_v18, %v801_v8  ;;  %v807_v27 = vpop.f32.mrb[23].mxu1  ;;  %v848_v31 = vmax.bf16 %v3698_v0, %v840_v9 }
 0x302   : > { %v823_v54 = vpack.c.bf16 %v807_v27, %v803_v47  ;;  %v849_v49 = vmax.bf16 %v3698_v0, %v841_v17 }
 0x303   : > { %v838_v55 = vadd.bf16 %v830_v59, %v822_v22 }
 0x304   : > { %v839_v48 = vadd.bf16 %v830_v59, %v823_v54  ;;  %926 = vmatprep.subr.bf16.mxu0 %v849_v49  ;;  %v4136_v54 = vpop.permute.xlu1 %864 }
 0x305   : > { %927 = vmatpush1.bf16.msra.mxu0 %v848_v31  ;;  %v846_v39 = vmax.bf16 %v3698_v0, %v838_v55 }
 0x306   : > { %v811_v35 = vpop.f32.mrb[24].mxu1  ;;  %v847_v52 = vmax.bf16 %v3698_v0, %v839_v48 }
 0x307   : > { %v813_v13 = vpop.f32.mrb[25].mxu1 }
 0x308   : > { %v815_v26 = vpop.f32.mrb[26].mxu1  ;;  %3039 = vmatmul.mubr.msk.bf16.vlgmr.msra.gmra.mrb[20].mxu0 %vm553_vm1, %v3533_v51  ;;  %997 = vmatprep.subr.bf16.mxu1 %v847_v52 }
 0x309   : > { %v826_v40 = vpack.c.bf16 %v815_v26, %v811_v35  ;;  %v817_v44 = vpop.f32.mrb[27].mxu1  ;;  %998 = vmatpush1.bf16.msra.mxu1 %v846_v39  ;;  %966 = vmatprep.mubr.bf16.mxu0 %v3698_v0 }
 0x30a   : > { %v827_v59 = vpack.c.bf16 %v817_v44, %v813_v13 }
 0x30b   : > { %v842_v53 = vadd.bf16 %v834_v61, %v826_v40 }
 0x30c   : > { %v843_v50 = vadd.bf16 %v834_v61, %v827_v59  ;;  %v3536_v61 = vld [vmem:[%s4782_s2 + $0x38] sm:$0xff]   ;;  %v4153_v59 = vpop.permute.xlu1 %869 }
 0x30d   : > { %v850_v58 = vmax.bf16 %v3698_v0, %v842_v53 }
 0x30e   : > { %v851_v57 = vmax.bf16 %v3698_v0, %v843_v50 }
 0x310   : > { %3040 = vmatmul.mubr.msk.bf16.gmra.mrb[24].mxu0 %vm553_vm1, %v3534_v56  ;;  %999 = vmatprep.subr.bf16.mxu1 %v851_v57 }
 0x311   : > { %1000 = vmatpush1.bf16.msra.mxu1 %v850_v58  ;;  %976 = vmatprep.mubr.bf16.mxu0 %v3698_v0 }
 0x314   : > { %3043 = vmatmul.mubr.msk.bf16.vlgmr.msra.gmra.mrb[28].mxu1 %vm553_vm1, %v3533_v51 }
 0x315   : > { %1039 = vmatprep.mubr.bf16.mxu1 %v3698_v0 }
 0x318   : > { %3041 = vmatmul.mubr.msk.bf16.gmra.mrb[28].mxu0 %vm553_vm1, %v3535_v60 }
 0x319   : > { %986 = vmatprep.mubr.bf16.mxu0 %v3698_v0 }
 0x31c   : > { %3044 = vmatmul.mubr.msk.bf16.gmra.mrb[32].mxu1 %vm553_vm1, %v3534_v56 }
 0x31d   : > { %1049 = vmatprep.mubr.bf16.mxu1 %v3698_v0 }
 0x320   : > { %3042 = vmatmul.mubr.msk.bf16.gmra.mrb[32].mxu0 %vm553_vm1, %v3536_v61 }
 0x321   : > { %1214 = vmatprep.mubr.bf16.mxu0 %v3698_v0 }
 0x324   : > { %3045 = vmatmul.mubr.msk.bf16.gmra.mrb[36].mxu1 %vm553_vm1, %v3535_v60 }
 0x325   : > { %1059 = vmatprep.mubr.bf16.mxu1 %v3698_v0 }
 0x32c   : > { %3046 = vmatmul.mubr.msk.bf16.gmra.mrb[40].mxu1 %vm553_vm1, %v3536_v61 }
 0x32d   : > { %1287 = vmatprep.mubr.bf16.mxu1 %v3698_v0 }
 0x3db   : > { %v958_v4 = vpop.f32.mrb[20].mxu0 }
 0x3dc   : > { %v959_v8 = vadd.f32 %v958_v4, %v855_v62  ;;  %v960_v9 = vpop.f32.mrb[21].mxu0 }
 0x3dd   : > { %v961_v47 = vadd.f32 %v960_v9, %v855_v62  ;;  %v962_v17 = vpop.f32.mrb[22].mxu0 }
 0x3de   : > { %v1070_v18 = vmax.f32 %v959_v8, 0.0  ;;  %v963_v22 = vadd.f32 %v962_v17, %v860_v63  ;;  %v964_v27 = vpop.f32.mrb[23].mxu0 }
 0x3df   : > { %v1071_v49 = vmax.f32 %v961_v47, 0.0  ;;  %v965_v55 = vadd.f32 %v964_v27, %v860_v63 }
 0x3e0   : > { %v1074_v31 = vmax.f32 %v963_v22, 0.0  ;;  %v4139_v51 = vadd.f32 %v1070_v18, %v3879_v6 }
 0x3e1   : > { %v1075_v48 = vmax.f32 %v965_v55, 0.0  ;;  %v4145_v52 = vadd.f32 %v1071_v49, %v3865_v1  ;;  %v4166_v55 = vpop.permute.xlu0 %874 }
 0x3e2   : > { %v4142_v35 = vadd.f32 %v1074_v31, %v3882_v7 }
 0x3e3   : > { %v4148_v39 = vadd.f32 %v1075_v48, %v3868_v2  ;;  %v968_v13 = vpop.f32.mrb[24].mxu0 }
 0x3e4   : > { %v1134_v26 = vpack.c.bf16 %v4142_v35, %v4139_v51  ;;  %v969_v40 = vadd.f32 %v968_v13, %v4136_v54  ;;  %v970_v44 = vpop.f32.mrb[25].mxu0 }
 0x3e5   : > { %4815 = vst [vmem:[#allocation9_spill] sm:$0xff] %v4148_v39  ;;  %v971_v6 = vadd.f32 %v970_v44, %v4136_v54  ;;  %v972_v53 = vpop.f32.mrb[26].mxu0  ;;  %v1135_v7 = vpack.c.bf16 %v4148_v39, %v4145_v52 }
 0x3e6   : > { %v1078_v1 = vmax.f32 %v969_v40, 0.0  ;;  %v973_v50 = vadd.f32 %v972_v53, %v4153_v59  ;;  %v974_v2 = vpop.f32.mrb[27].mxu0 }
 0x3e7   : > { %v1079_v56 = vmax.f32 %v971_v6, 0.0  ;;  %v975_v57 = vadd.f32 %v974_v2, %v4153_v59  ;;  %v1031_v58 = vpop.f32.mrb[28].mxu1  ;;  %1182 = vmatprep.subr.bf16.mxu0 %v1135_v7  ;;  %v4177_v6 = vpop.permute.xlu1 %879 }
 0x3e8   : > { %v1082_v60 = vmax.f32 %v973_v50, 0.0  ;;  %v1032_v61 = vadd.f32 %v1031_v58, %v855_v62  ;;  %v1033_v4 = vpop.f32.mrb[29].mxu1  ;;  %1183 = vmatpush1.bf16.msra.mxu0 %v1134_v26  ;;  %v4161_v17 = vadd.f32 %v1078_v1, %v3913_v19 }
 0x3e9   : > { %v1083_v8 = vmax.f32 %v975_v57, 0.0  ;;  %v1034_v9 = vadd.f32 %v1033_v4, %v855_v62  ;;  %v1035_v47 = vpop.f32.mrb[30].mxu1  ;;  %v4169_v31 = vadd.f32 %v1079_v56, %v3895_v12 }
 0x3ea   : > { %v4164_v18 = vadd.f32 %v1082_v60, %v3916_v20  ;;  %v1072_v22 = vmax.f32 %v1032_v61, 0.0  ;;  %v1036_v27 = vadd.f32 %v1035_v47, %v860_v63  ;;  %v1037_v49 = vpop.f32.mrb[31].mxu1 }
 0x3eb   : > { %v4172_v48 = vadd.f32 %v1083_v8, %v3900_v14  ;;  %v1073_v13 = vmax.f32 %v1034_v9, 0.0  ;;  %v1038_v62 = vadd.f32 %v1037_v49, %v860_v63  ;;  %v978_v26 = vpop.f32.mrb[28].mxu0 }
 0x3ec   : > { %v1138_v19 = vpack.c.bf16 %v4164_v18, %v4161_v17  ;;  %v1076_v40 = vmax.f32 %v1036_v27, 0.0  ;;  %v979_v20 = vadd.f32 %v978_v26, %v4166_v55  ;;  %v980_v44 = vpop.f32.mrb[29].mxu0  ;;  %v4183_v1 = vadd.f32 %v1072_v22, %v3889_v10 }
 0x3ed   : > { %v1077_v53 = vmax.f32 %v1038_v62, 0.0  ;;  %v981_v7 = vadd.f32 %v980_v44, %v4166_v55  ;;  %v982_v12 = vpop.f32.mrb[30].mxu0  ;;  %v1139_v14 = vpack.c.bf16 %v4172_v48, %v4169_v31  ;;  %v4190_v57 = vadd.f32 %v1073_v13, %v3871_v3 }
 0x3ee   : > { %4816 = vst [vmem:[#allocation10_spill] sm:$0xff] %v4183_v1  ;;  %v4186_v63 = vadd.f32 %v1076_v40, %v3892_v11  ;;  %v1086_v50 = vmax.f32 %v979_v20, 0.0  ;;  %v983_v2 = vadd.f32 %v982_v12, %v4177_v6  ;;  %v984_v56 = vpop.f32.mrb[31].mxu0  ;;  %v4209_v40 = vpop.permute.xlu0 %884 }
 0x3ef   : > { %4818 = vst [vmem:[#allocation12_spill] sm:$0xff] %v4190_v57  ;;  %v4193_v58 = vadd.f32 %v1077_v53, %v3876_v5  ;;  %v1087_v60 = vmax.f32 %v981_v7, 0.0  ;;  %v985_v61 = vadd.f32 %v984_v56, %v4177_v6  ;;  %v1041_v4 = vpop.f32.mrb[32].mxu1  ;;  %1184 = vmatprep.subr.bf16.mxu0 %v1139_v14  ;;  %v890_v14 = vpop.permute.xlu1 %889 }
 0x3f0   : > { %4817 = vst [vmem:[#allocation11_spill] sm:$0xff] %v4186_v63  ;;  %v1136_v10 = vpack.c.bf16 %v4186_v63, %v4183_v1  ;;  %v1090_v11 = vmax.f32 %v983_v2, 0.0  ;;  %v1042_v8 = vadd.f32 %v1041_v4, %v4136_v54  ;;  %v1043_v9 = vpop.f32.mrb[33].mxu1  ;;  %1185 = vmatpush1.bf16.msra.mxu0 %v1138_v19  ;;  %v4203_v27 = vadd.f32 %v1086_v50, %v3943_v30 }
 0x3f1   : > { %4819 = vst [vmem:[#allocation13_spill] sm:$0xff] %v4193_v58  ;;  %v1091_v47 = vmax.f32 %v985_v61, 0.0  ;;  %v1044_v3 = vadd.f32 %v1043_v9, %v4136_v54  ;;  %v1045_v22 = vpop.f32.mrb[34].mxu1  ;;  %v1137_v5 = vpack.c.bf16 %v4193_v58, %v4190_v57  ;;  %v4212_v19 = vadd.f32 %v1087_v60, %v3927_v24 }
 0x3f2   : > { %v4206_v49 = vadd.f32 %v1090_v11, %v3948_v32  ;;  %v1080_v13 = vmax.f32 %v1042_v8, 0.0  ;;  %v1046_v62 = vadd.f32 %v1045_v22, %v4153_v59  ;;  %v1047_v26 = vpop.f32.mrb[35].mxu1 }
 0x3f3   : > { %4820 = vst [vmem:[#allocation14_spill] sm:$0xff] %v4212_v19  ;;  %v4215_v54 = vadd.f32 %v1091_v47, %v3930_v25  ;;  %v1081_v20 = vmax.f32 %v1044_v3, 0.0  ;;  %v1048_v44 = vadd.f32 %v1047_v26, %v4153_v59  ;;  %v988_v30 = vpop.f32.mrb[32].mxu0  ;;  %1255 = vmatprep.subr.bf16.mxu1 %v1137_v5 }
 0x3f4   : > { %v1142_v32 = vpack.c.bf16 %v4206_v49, %v4203_v27  ;;  %v1084_v53 = vmax.f32 %v1046_v62, 0.0  ;;  %v989_v7 = vadd.f32 %v988_v30, %v4209_v40  ;;  %v990_v12 = vpop.f32.mrb[33].mxu0  ;;  %1256 = vmatpush1.bf16.msra.mxu1 %v1136_v10  ;;  %v4225_v59 = vadd.f32 %v1080_v13, %v3919_v21 }
 0x3f5   : > { %4821 = vst [vmem:[#allocation15_spill] sm:$0xff] %v4215_v54  ;;  %v1085_v50 = vmax.f32 %v1048_v44, 0.0  ;;  %v991_v24 = vadd.f32 %v990_v12, %v4209_v40  ;;  %v992_v2 = vpop.f32.mrb[34].mxu0  ;;  %v1143_v25 = vpack.c.bf16 %v4215_v54, %v4212_v19  ;;  %v4231_v11 = vadd.f32 %v1081_v20, %v3903_v15 }
 0x3f6   : > { %4822 = vst [vmem:[#allocation16_spill] sm:$0xff] %v4225_v59  ;;  %v4228_v56 = vadd.f32 %v1084_v53, %v3924_v23  ;;  %v1094_v60 = vmax.f32 %v989_v7, 0.0  ;;  %v993_v61 = vadd.f32 %v992_v2, %v890_v14  ;;  %v994_v4 = vpop.f32.mrb[35].mxu0 }
 0x3f7   : > { %4824 = vst [vmem:[#allocation18_spill] sm:$0xff] %v4231_v11  ;;  %v4234_v10 = vadd.f32 %v1085_v50, %v3906_v16  ;;  %v1095_v8 = vmax.f32 %v991_v24, 0.0  ;;  %v995_v9 = vadd.f32 %v994_v4, %v890_v14  ;;  %v1051_v47 = vpop.f32.mrb[36].mxu1  ;;  %1186 = vmatprep.subr.bf16.mxu0 %v1143_v25  ;;  %v3537_v25 = vld [vmem:[%s4781_s1 + $0x10] sm:$0xff]  }
 0x3f8   : > { %4823 = vst [vmem:[#allocation17_spill] sm:$0xff] %v4228_v56  ;;  %v1140_v21 = vpack.c.bf16 %v4228_v56, %v4225_v59  ;;  %v1098_v3 = vmax.f32 %v993_v61, 0.0  ;;  %v1052_v23 = vadd.f32 %v1051_v47, %v4166_v55  ;;  %v1053_v22 = vpop.f32.mrb[37].mxu1  ;;  %1187 = vmatpush1.bf16.msra.mxu0 %v1142_v32  ;;  %v4243_v62 = vadd.f32 %v1094_v60, %v3975_v42 }
 0x3f9   : > { %4825 = vst [vmem:[#allocation19_spill] sm:$0xff] %v4234_v10  ;;  %v1099_v5 = vmax.f32 %v995_v9, 0.0  ;;  %v1054_v13 = vadd.f32 %v1053_v22, %v4166_v55  ;;  %v1055_v15 = vpop.f32.mrb[38].mxu1  ;;  %v1141_v16 = vpack.c.bf16 %v4234_v10, %v4231_v11  ;;  %v4250_v53 = vadd.f32 %v1095_v8, %v3959_v36 }
 0x3fa   : > { %v4246_v26 = vadd.f32 %v1098_v3, %v3978_v43  ;;  %v1088_v20 = vmax.f32 %v1052_v23, 0.0  ;;  %v1056_v44 = vadd.f32 %v1055_v15, %v4177_v6  ;;  %v1057_v30 = vpop.f32.mrb[39].mxu1 }
 0x3fb   : > { %4826 = vst [vmem:[#allocation20_spill] sm:$0xff] %v4250_v53  ;;  %v4253_v32 = vadd.f32 %v1099_v5, %v3962_v37  ;;  %v1089_v55 = vmax.f32 %v1054_v13, 0.0  ;;  %v1058_v7 = vadd.f32 %v1057_v30, %v4177_v6  ;;  %1257 = vmatprep.subr.bf16.mxu1 %v1141_v16  ;;  %v4330_v16 = vld [vmem:[%s4783_s3 + $0x8] sm:$0xff]  }
 0x3fc   : > { %v1146_v42 = vpack.c.bf16 %v4246_v26, %v4243_v62  ;;  %v1092_v12 = vmax.f32 %v1056_v44, 0.0  ;;  %1258 = vmatpush1.bf16.msra.mxu1 %v1140_v21  ;;  %v4261_v24 = vadd.f32 %v1088_v20, %v3951_v33  ;;  %v4343_v20 = vld [vmem:[%s4783_s3 + $0x18] sm:$0xff]   ;;  %v4351_v44 = vld [vmem:[%s4783_s3 + $0x20] sm:$0xff]   ;;  %v4358_v30 = vld [vmem:[%s4783_s3 + $0x28] sm:$0xff]  }
 0x3fd   : > { %4827 = vst [vmem:[#allocation21_spill] sm:$0xff] %v4253_v32  ;;  %v1093_v43 = vmax.f32 %v1058_v7, 0.0  ;;  %v1147_v50 = vpack.c.bf16 %v4253_v32, %v4250_v53  ;;  %v4267_v37 = vadd.f32 %v1089_v55, %v3937_v28  ;;  %v4365_v55 = vld [vmem:[%s4783_s3 + $0x30] sm:$0xff]   ;;  %v4372_v7 = vld [vmem:[%s4783_s3 + $0x38] sm:$0xff]  }
 0x3fe   : > { %4828 = vst [vmem:[#allocation22_spill] sm:$0xff] %v4261_v24  ;;  %v4264_v36 = vadd.f32 %v1092_v12, %v3954_v34 }
 0x3ff   : > { %4830 = vst [vmem:[#allocation24_spill] sm:$0xff] %v4267_v37  ;;  %v4270_v6 = vadd.f32 %v1093_v43, %v3940_v29  ;;  %v1061_v2 = vpop.f32.mrb[40].mxu1  ;;  %1188 = vmatprep.subr.bf16.mxu0 %v1147_v50 }
 0x400   : > { %4829 = vst [vmem:[#allocation23_spill] sm:$0xff] %v4264_v36  ;;  %v1144_v60 = vpack.c.bf16 %v4264_v36, %v4261_v24  ;;  %v1062_v33 = vadd.f32 %v1061_v2, %v4209_v40  ;;  %v1063_v61 = vpop.f32.mrb[41].mxu1  ;;  %1189 = vmatpush1.bf16.msra.mxu0 %v1146_v42 }
 0x401   : > { %4831 = vst [vmem:[#allocation25_spill] sm:$0xff] %v4270_v6  ;;  %v1064_v34 = vadd.f32 %v1063_v61, %v4209_v40  ;;  %v1065_v28 = vpop.f32.mrb[42].mxu1  ;;  %v1145_v29 = vpack.c.bf16 %v4270_v6, %v4267_v37 }
 0x402   : > { %v1096_v4 = vmax.f32 %v1062_v33, 0.0  ;;  %v1066_v8 = vadd.f32 %v1065_v28, %v890_v14  ;;  %v1067_v9 = vpop.f32.mrb[43].mxu1 }
 0x403   : > { %v1097_v47 = vmax.f32 %v1064_v34, 0.0  ;;  %v1068_v21 = vadd.f32 %v1067_v9, %v890_v14  ;;  %3051 = vmatmul.mubr.msk.bf16.vlgmr.msra.gmra.mrb[36].mxu0 %vm394_vm0, %v3537_v25  ;;  %1259 = vmatprep.subr.bf16.mxu1 %v1145_v29  ;;  %v3538_v14 = vld [vmem:[%s4781_s1 + $0x18] sm:$0xff]  }
 0x404   : > { %v1100_v3 = vmax.f32 %v1066_v8, 0.0  ;;  %1260 = vmatpush1.bf16.msra.mxu1 %v1144_v60  ;;  %1224 = vmatprep.mubr.bf16.mxu0 %v3698_v0  ;;  %v4284_v22 = vadd.f32 %v1096_v4, %v3983_v45 }
 0x405   : > { %v1101_v23 = vmax.f32 %v1068_v21, 0.0  ;;  %v4290_v5 = vadd.f32 %v1097_v47, %v3965_v38  ;;  %v3539_v38 = vld [vmem:[%s4781_s1 + $0x20] sm:$0xff]  }
 0x406   : > { %4832 = vst [vmem:[#allocation26_spill] sm:$0xff] %v4284_v22  ;;  %v4287_v40 = vadd.f32 %v1100_v3, %v3986_v46  ;;  %v4323_v46 = vld [vmem:[%s4783_s3] sm:$0xff]  }
 0x407   : > { %4834 = vst [vmem:[#allocation28_spill] sm:$0xff] %v4290_v5  ;;  %v4293_v13 = vadd.f32 %v1101_v23, %v3972_v41  ;;  %v3540_v41 = vld [vmem:[%s4781_s1 + $0x28] sm:$0xff]   ;;  %3221 = vmatprep.subr.bf16.mxu0 %v4323_v46 }
 0x408   : > { %4833 = vst [vmem:[#allocation27_spill] sm:$0xff] %v4287_v40  ;;  %v1148_v15 = vpack.c.bf16 %v4287_v40, %v4284_v22  ;;  %3222 = vmatpush3.bf16.msra.mxu0 %v4323_v46 }
 0x409   : > { %4835 = vst [vmem:[#allocation29_spill] sm:$0xff] %v4293_v13  ;;  %v1149_v45 = vpack.c.bf16 %v4293_v13, %v4290_v5  ;;  %3223 = vmatprep.subr.bf16.mxu0 %v4330_v16 }
 0x40b   : > { %3052 = vmatmul.mubr.msk.bf16.gmra.mrb[40].mxu0 %vm394_vm0, %v3538_v14  ;;  %1261 = vmatprep.subr.bf16.mxu1 %v1149_v45 }
 0x40c   : > { %1262 = vmatpush1.bf16.msra.mxu1 %v1148_v15  ;;  %1234 = vmatprep.mubr.bf16.mxu0 %v3698_v0 }
 0x40d   : > { %3224 = vmatpush3.bf16.msra.mxu0 %v4330_v16 }
 0x40f   : > { %3055 = vmatmul.mubr.msk.bf16.vlgmr.msra.gmra.mrb[44].mxu1 %vm394_vm0, %v3537_v25 }
 0x410   : > { %1297 = vmatprep.mubr.bf16.mxu1 %v3698_v0 }
 0x413   : > { %3053 = vmatmul.mubr.msk.bf16.gmra.mrb[44].mxu0 %vm394_vm0, %v3539_v38 }
 0x414   : > { %1244 = vmatprep.mubr.bf16.mxu0 %v3698_v0 }
 0x417   : > { %3056 = vmatmul.mubr.msk.bf16.gmra.mrb[48].mxu1 %vm394_vm0, %v3538_v14 }
 0x418   : > { %1307 = vmatprep.mubr.bf16.mxu1 %v3698_v0 }
 0x41b   : > { %3054 = vmatmul.mubr.msk.bf16.gmra.mrb[48].mxu0 %vm394_vm0, %v3540_v41 }
 0x41f   : > { %3057 = vmatmul.mubr.msk.bf16.gmra.mrb[52].mxu1 %vm394_vm0, %v3539_v38 }
 0x420   : > { %1317 = vmatprep.mubr.bf16.mxu1 %v3698_v0  ;;  %v4337_v0 = vld [vmem:[%s4783_s3 + $0x10] sm:$0xff]  }
 0x421   : > { %3225 = vmatprep.subr.bf16.mxu0 %v4337_v0 }
 0x422   : > { %3226 = vmatpush3.bf16.msra.mxu0 %v4337_v0 }
 0x423   : > { %3227 = vmatprep.subr.bf16.mxu0 %v4343_v20 }
 0x426   : > { %3228 = vmatpush3.bf16.msra.mxu0 %v4343_v20 }
 0x427   : > { %3058 = vmatmul.mubr.msk.bf16.gmra.mrb[56].mxu1 %vm394_vm0, %v3540_v41  ;;  %3229 = vmatprep.subr.bf16.mxu0 %v4351_v44 }
 0x42a   : > { %3230 = vmatpush3.bf16.msra.mxu0 %v4351_v44 }
 0x42b   : > { %3231 = vmatprep.subr.bf16.mxu0 %v4358_v30 }
 0x42e   : > { %3232 = vmatpush3.bf16.msra.mxu0 %v4358_v30 }
 0x42f   : > { %3233 = vmatprep.subr.bf16.mxu0 %v4365_v55 }
 0x432   : > { %3234 = vmatpush3.bf16.msra.mxu0 %v4365_v55 }
 0x433   : > { %3235 = vmatprep.subr.bf16.mxu0 %v4372_v7 }
 0x436   : > { %3236 = vmatpush3.bf16.msra.mxu0 %v4372_v7 }
 0x4d6   : > { %v1216_v42 = vpop.f32.mrb[36].mxu0 }
 0x4d7   : > { %v1218_v12 = vpop.f32.mrb[37].mxu0 }
 0x4d8   : > { %v1220_v43 = vpop.f32.mrb[38].mxu0 }
 0x4d9   : > { %v1328_v50 = vpack.c.bf16 %v1220_v43, %v1216_v42  ;;  %v1222_v2 = vpop.f32.mrb[39].mxu0 }
 0x4da   : > { %v4376_v25 = vpack.c.bf16 %v1222_v2, %v1218_v12 }
 0x4db   : > { %3241 = vmatprep.subr.bf16.mxu1 %v1328_v50 }
 0x4dc   : > { %3242 = vmatpush3.bf16.msra.mxu1 %v1328_v50 }
 0x4de   : > { %v1226_v60 = vpop.f32.mrb[40].mxu0 }
 0x4df   : > { %v1228_v33 = vpop.f32.mrb[41].mxu0 }
 0x4e0   : > { %v1230_v61 = vpop.f32.mrb[42].mxu0 }
 0x4e1   : > { %v1332_v34 = vpack.c.bf16 %v1230_v61, %v1226_v60  ;;  %v1232_v28 = vpop.f32.mrb[43].mxu0 }
 0x4e2   : > { %v1333_v29 = vpack.c.bf16 %v1232_v28, %v1228_v33 }
 0x4e6   : > { %v1236_v4 = vpop.f32.mrb[44].mxu0 }
 0x4e7   : > { %v1238_v8 = vpop.f32.mrb[45].mxu0 }
 0x4e8   : > { %v1240_v9 = vpop.f32.mrb[46].mxu0 }
 0x4e9   : > { %v1336_v47 = vpack.c.bf16 %v1240_v9, %v1236_v4  ;;  %v1242_v21 = vpop.f32.mrb[47].mxu0 }
 0x4ea   : > { %v4378_v3 = vpack.c.bf16 %v1242_v21, %v1238_v8 }
 0x4eb   : > { %v1353_v42 = vrot.slane %v1336_v47, 4 }
 0x4ec   : > { %v1356_v43 = vrot.slane %v4378_v3, 4 }
 0x4ee   : > { %v1246_v23 = vpop.f32.mrb[48].mxu0 }
 0x4ef   : > { %v1248_v14 = vpop.f32.mrb[49].mxu0 }
 0x4f0   : > { %v1250_v15 = vpop.f32.mrb[50].mxu0 }
 0x4f1   : > { %v1340_v45 = vpack.c.bf16 %v1250_v15, %v1246_v23  ;;  %v1252_v38 = vpop.f32.mrb[51].mxu0 }
 0x4f2   : > { %v1341_v41 = vpack.c.bf16 %v1252_v38, %v1248_v14 }
 0x4f3   : > { %v1354_v12 = vrot.slane %v1340_v45, 4 }
 0x4f4   : > { %v4381_v50 = vrot.slane %v1341_v41, 4 }
 0x4f5   : > { %v1377_v2 = vmax.bf16 %v1354_v12, %v1336_v47  ;;  %v1355_v60 = vsel %vm1352_vm2, %v1353_v42, %v1354_v12 }
 0x4f6   : > { %v1378_v33 = vmax.bf16 %v4381_v50, %v4378_v3  ;;  %v1373_v61 = vmax.bf16 %v1355_v60, %v1332_v34  ;;  %v1358_v28 = vsel %vm1352_vm2, %v1356_v43, %v4381_v50  ;;  %v4393_v34 = vld [vmem:[%s4782_s2 + $0x40] sm:$0xff]  }
 0x4f7   : > { %v1374_v4 = vmax.bf16 %v1358_v28, %v1333_v29 }
 0x4f8   : > { %3237 = vmatprep.mubr.bf16.mxu0 %v1373_v61 }
 0x4f9   : > { %3238 = vmatmul.mubr.bf16.vlgmr.msra.gmra.mrb[52].mxu0 %v1377_v2 }
 0x4fa   : > { %3251 = vmatprep.mubr.msk.bf16.mxu0 %vm553_vm1, %v4393_v34 }
 0x5cc   : > { %v3239_v8 = vpop.f32.mrb[52].mxu0 }
 0x5cd   : > { %v1463_v9 = vpop.f32.mrb[53].mxu0 }
 0x5ce   : > { %v3240_v21 = vpop.f32.mrb[54].mxu0 }
 0x5cf   : > { %v1466_v23 = vpop.f32.mrb[55].mxu0  ;;  %v4407_v21 = vld [vmem:[%s4782_s2 + $0x50] sm:$0xff]  }
 0x5d0   : > { %v3487_v14 = vpack.i.bf16 %v3239_v8, %v1466_v23 }
 0x5d2   : > { %3488 = vrot.lane.b32.xlu0 %v3487_v14, %s3702_s21  ;;  %v1289_v14 = vpop.f32.mrb[44].mxu1 }
 0x5d6   : > { %1480 = vrot.lane.b32.xlu0 %v1463_v9, %s3702_s21 }
 0x644   : > { %v3489_v47 = vpop.permute.xlu0 %3488 }
 0x645   : > { %v3491_v3 = vunpack.i.h.bf16 %v3489_v47  ;;  %v3490_v29 = vunpack.i.l.bf16 %v3489_v47  ;;  %v1291_v47 = vpop.f32.mrb[45].mxu1 }
 0x647   : > { %v1491_v15 = vmax.f32 %v3239_v8, %v3491_v3  ;;  %v1490_v45 = vmax.f32 %v1466_v23, %v3490_v29  ;;  %v4402_v8 = vld [vmem:[%s4782_s2 + $0x48] sm:$0xff]   ;;  %v1293_v3 = vpop.f32.mrb[46].mxu1 }
 0x648   : > { %v1481_v42 = vpop.permute.xlu0 %1480  ;;  %v4438_v29 = vpack.c.bf16 %v1293_v3, %v1289_v14 }
 0x649   : > { %v3492_v38 = vpack.i.bf16 %v1491_v15, %v1490_v45  ;;  %v1505_v41 = vpack.c.bf16 %v1491_v15, %v1490_v45  ;;  %v1489_v12 = vmax.f32 %v1463_v9, %v1481_v42  ;;  %v4419_v9 = vld [vmem:[%s4782_s2 + $0x58] sm:$0xff]   ;;  %v1295_v15 = vpop.f32.mrb[47].mxu1 }
 0x64a   : > { %v4440_v45 = vpack.c.bf16 %v1295_v15, %v1291_v47 }
 0x64b   : > { %3493 = vrot.lane.b32.xlu1 %v3492_v38, %s3703_s14  ;;  %3247 = vmatprep.subr.bf16.mxu0 %v1505_v41  ;;  %v4442_v38 = vpop.f32.mrb[48].mxu1 }
 0x64c   : > { %3248 = vmatpush3.bf16.msra.mxu0 %v1505_v41  ;;  %4836 = vst [vmem:[#allocation30_spill] sm:$0xff] %v4440_v45  ;;  %v4444_v41 = vpop.f32.mrb[49].mxu1 }
 0x64f   : > { %1493 = vrot.lane.b32.xlu1 %v1489_v12, %s3703_s14 }
 0x6bd   : > { %v3494_v43 = vpop.permute.xlu1 %3493 }
 0x6be   : > { %v3496_v50 = vunpack.i.h.bf16 %v3494_v43  ;;  %v3495_v2 = vunpack.i.l.bf16 %v3494_v43 }
 0x6c0   : > { %v1506_v60 = vpack.c.bf16 %v3496_v50, %v3495_v2 }
 0x6c1   : > { %v1494_v61 = vpop.permute.xlu1 %1493 }
 0x6c2   : > { %v1496_v28 = vpack.c.bf16 %v1494_v61, %v1489_v12  ;;  %3249 = vmatprep.subr.bf16.mxu0 %v1506_v60 }
 0x6c3   : > { %3250 = vmatpush3.bf16.msra.mxu0 %v1506_v60 }
 0x6c4   : > { %1507 = vxpose.xlu0.c.b16.start.end [1/1] (short) (narrow) %v1496_v28, 32  ;;  %3271 = vmatprep.subr.bf16.mxu0 %v4323_v46 }
 0x6c6   : > { %3252 = vmatmul.mubr.msk.bf16.vlgmr.msra.gmra.mrb[56].mxu0 %vm553_vm1, %v4402_v8 }
 0x6c7   : > { %3272 = vmatpush3.bf16.msra.mxu0 %v4323_v46  ;;  %3255 = vmatprep.mubr.msk.bf16.mxu0 %vm553_vm1, %v4407_v21 }
 0x6c8   : > { %3273 = vmatprep.subr.bf16.mxu0 %v4330_v16 }
 0x6cb   : > { %3274 = vmatpush3.bf16.msra.mxu0 %v4330_v16 }
 0x6cc   : > { %3275 = vmatprep.subr.bf16.mxu0 %v4337_v0 }
 0x6ce   : > { %3256 = vmatmul.mubr.msk.bf16.gmra.mrb[60].mxu0 %vm553_vm1, %v4419_v9 }
 0x6cf   : > { %3276 = vmatpush3.bf16.msra.mxu0 %v4337_v0  ;;  %3287 = vmatprep.mubr.bf16.mxu0 %v1374_v4 }
 0x6d0   : > { %3277 = vmatprep.subr.bf16.mxu0 %v4343_v20 }
 0x6d3   : > { %3278 = vmatpush3.bf16.msra.mxu0 %v4343_v20 }
 0x6d4   : > { %3279 = vmatprep.subr.bf16.mxu0 %v4351_v44 }
 0x6d7   : > { %3280 = vmatpush3.bf16.msra.mxu0 %v4351_v44 }
 0x6d8   : > { %3281 = vmatprep.subr.bf16.mxu0 %v4358_v30 }
 0x6db   : > { %3282 = vmatpush3.bf16.msra.mxu0 %v4358_v30 }
 0x6dc   : > { %3283 = vmatprep.subr.bf16.mxu0 %v4365_v55 }
 0x6df   : > { %3284 = vmatpush3.bf16.msra.mxu0 %v4365_v55 }
 0x6e0   : > { %3285 = vmatprep.subr.bf16.mxu0 %v4372_v7 }
 0x6e3   : > { %3286 = vmatpush3.bf16.msra.mxu0 %v4372_v7 }
 0x6e6   : > { %3288 = vmatmul.mubr.bf16.vlgmr.msra.gmra.mrb[64].mxu0 %v1378_v33  ;;  %v4446_v33 = vpop.f32.mrb[50].mxu1 }
 0x6e7   : > { %v4450_v12 = vpop.f32.mrb[51].mxu1 }
 0x6e8   : > { %v1309_v50 = vpop.f32.mrb[52].mxu1 }
 0x6e9   : > { %v1311_v2 = vpop.f32.mrb[53].mxu1 }
 0x6ea   : > { %v1313_v60 = vpop.f32.mrb[54].mxu1 }
 0x6eb   : > { %v4454_v61 = vpack.c.bf16 %v1313_v60, %v1309_v50  ;;  %v1315_v28 = vpop.f32.mrb[55].mxu1 }
 0x6ed   : > { %v1359_v39 = vrot.slane %v4454_v61, 4 }
 0x72a   : > { %v1515_v4 = vpop.trf.xlu0 }
 0x72b   : > { %3243 = vmatprep.mubr.msk.bf16.mxu1 %vm1523_vm3, %v1515_v4  ;;  %v4456_v4 = vpack.c.bf16 %v1315_v28, %v1311_v2 }
 0x72e   : > { %v1516_v23 = vpop.trf.xlu0 }
 0x72f   : > { %3244 = vmatmul.mubr.msk.bf16.vlgmr.msra.gmra.mrb[60].mxu1 %vm1523_vm3, %v1516_v23  ;;  %v1319_v23 = vpop.f32.mrb[56].mxu1 }
 0x730   : > { %v1321_v14 = vpop.f32.mrb[57].mxu1 }
 0x731   : > { %v1323_v47 = vpop.f32.mrb[58].mxu1 }
 0x732   : > { %v1342_v3 = vpack.c.bf16 %v1323_v47, %v1319_v23  ;;  %v1325_v15 = vpop.f32.mrb[59].mxu1 }
 0x733   : > { %v1343_v6 = vpack.c.bf16 %v1325_v15, %v1321_v14 }
 0x734   : > { %v4458_v42 = vrot.slane %v1342_v3, 4 }
 0x735   : > { %v4460_v13 = vrot.slane %v1343_v6, 4 }
 0x799   : > { %v4466_v60 = vpop.f32.mrb[56].mxu0 }
 0x79a   : > { %v1680_v2 = vpop.f32.mrb[57].mxu0 }
 0x79b   : > { %v4468_v28 = vpop.f32.mrb[58].mxu0 }
 0x79c   : > { %v1683_v47 = vpop.f32.mrb[59].mxu0 }
 0x79d   : > { %v1711_v14 = vpack.c.bf16 %v1683_v47, %v1680_v2 }
 0x79f   : > { %3263 = vmatprep.mubr.msk.bf16.mxu1 %vm553_vm1, %v1711_v14 }
 0x7a1   : > { %v4473_v6 = vpop.f32.mrb[60].mxu0 }
 0x7a2   : > { %v4475_v3 = vpop.f32.mrb[61].mxu0 }
 0x7a3   : > { %v4477_v15 = vpop.f32.mrb[62].mxu0 }
 0x7a4   : > { %v4481_v43 = vpop.f32.mrb[63].mxu0 }
 0x7b9   : > { %v3289_v5 = vpop.f32.mrb[64].mxu0 }
 0x7ba   : > { %v1861_v23 = vpop.f32.mrb[65].mxu0 }
 0x7bb   : > { %1878 = vrot.lane.b32.xlu1 %v1861_v23, %s3702_s21  ;;  %v3290_v2 = vpop.f32.mrb[66].mxu0 }
 0x7bc   : > { %v1864_v47 = vpop.f32.mrb[67].mxu0 }
 0x7bd   : > { %v3497_v14 = vpack.i.bf16 %v3289_v5, %v1864_v47 }
 0x7bf   : > { %3498 = vrot.lane.b32.xlu1 %v3497_v14, %s3702_s21 }
 0x802   : > { %v3245_v58 = vpop.f32.mrb[60].mxu1 }
 0x803   : > { %v1564_v10 = vpop.f32.mrb[61].mxu1 }
 0x804   : > { %v3246_v57 = vpop.f32.mrb[62].mxu1 }
 0x805   : > { %v1580_v11 = vmax.f32 %v3245_v58, %v3246_v57  ;;  %v1567_v36 = vpop.f32.mrb[63].mxu1 }
 0x806   : > { %v1579_v50 = vmax.f32 %v1564_v10, %v1567_v36 }
 0x808   : > { %v1581_v40 = vmax.f32 %v1579_v50, %v1580_v11  ;;  %v1362_v11 = vrot.slane %v4456_v4, 4 }
 0x80a   : > { %v1582_v24 = vrot.slane %v1581_v40, 4 }
 0x80c   : > { %v1583_v22 = vmax.f32 %v1581_v40, %v1582_v24 }
 0x80e   : > { %v1584_v63 = vrot.slane %v1583_v22, 2 }
 0x810   : > { %v1585_v37 = vmax.f32 %v1583_v22, %v1584_v63  ;;  %v1361_v63 = vsel %vm1352_vm2, %v1359_v39, %v4458_v42 }
 0x812   : > { %v1586_v56 = vrot.slane %v1585_v37, 1 }
 0x814   : > { %v1587_v1 = vmax.f32 %v1585_v37, %v1586_v56  ;;  %v4837_v56 = vpack.c.bf16 %v4446_v33, %v4442_v38 }
 0x816   : > { %v1588_v59 = vsub.f32 %v1564_v10, %v1587_v1  ;;  %v1589_v45 = vsub.f32 %v1567_v36, %v1587_v1  ;;  %v1590_v2 = vsub.f32 %v3245_v58, %v1587_v1  ;;  %v1591_v54 = vsub.f32 %v3246_v57, %v1587_v1 }
 0x817   : > { %v4494_v58 = vmax.bf16 %v1361_v63, %v4837_v56  ;;  %v1364_v1 = vsel %vm1352_vm2, %v1362_v11, %v4460_v13  ;;  %v4838_v57 = vpack.c.bf16 %v4450_v12, %v4444_v41 }
 0x818   : > { %v1592_v32 = vmul.f32 1.442695, %v1588_v59  ;;  %v1594_v19 = vmul.f32 1.442695, %v1589_v45  ;;  %v1596_v14 = vmul.f32 1.442695, %v1590_v2 }
 0x819   : > { %v1598_v53 = vmul.f32 1.442695, %v1591_v54  ;;  %v4501_v54 = vmax.bf16 %v1364_v1, %v4838_v57 }
 0x81a   : > { %3553 = vpow2.f32 %v1592_v32 }
 0x81b   : > { %3555 = vpow2.f32 %v1594_v19 }
 0x81c   : > { %3557 = vpow2.f32 %v1596_v14 }
 0x81d   : > { %3559 = vpow2.f32 %v1598_v53 }
 0x824   : > { %v3554_v19 = vpop.eup %3553 }
 0x825   : > { %v3556_v59 = vpop.eup %3555 }
 0x826   : > { %v3558_v10 = vpop.eup %3557  ;;  %v1600_v53 = vadd.f32 %v3556_v59, %v3554_v19 }
 0x827   : > { %v3560_v32 = vpop.eup %3559 }
 0x828   : > { %v1601_v24 = vadd.f32 %v3558_v10, %v1600_v53 }
 0x82a   : > { %v1602_v39 = vadd.f32 %v3560_v32, %v1601_v24 }
 0x82c   : > { %v1603_v36 = vrot.slane %v1602_v39, 4 }
 0x82d   : > { %v1879_v37 = vpop.permute.xlu1 %1878 }
 0x82e   : > { %v1604_v22 = vadd.f32 %v1603_v36, %v1602_v39  ;;  %v1887_v40 = vmax.f32 %v1861_v23, %v1879_v37 }
 0x830   : > { %v1605_v45 = vrot.slane %v1604_v22, 2  ;;  %1891 = vrot.lane.b32.xlu1 %v1887_v40, %s3703_s14 }
 0x831   : > { %v3499_v38 = vpop.permute.xlu1 %3498 }
 0x832   : > { %v1606_v33 = vadd.f32 %v1605_v45, %v1604_v22  ;;  %v3501_v50 = vunpack.i.h.bf16 %v3499_v38  ;;  %v3500_v41 = vunpack.i.l.bf16 %v3499_v38  ;;  %v1794_v45 = vmul.f32 2.0, %v4139_v51 }
 0x834   : > { %v1607_v12 = vrot.slane %v1606_v33, 1  ;;  %v1889_v2 = vmax.f32 %v3289_v5, %v3501_v50  ;;  %v1888_v14 = vmax.f32 %v1864_v47, %v3500_v41  ;;  %v4839_v5 = vpack.c.bf16 %v4468_v28, %v4466_v60 }
 0x835   : > { %v4840_v47 = vpack.c.bf16 %v4481_v43, %v4475_v3  ;;  %v1797_v41 = vmul.f32 2.0, %v4164_v18 }
 0x836   : > { %v1608_v11 = vadd.f32 %v1607_v12, %v1606_v33  ;;  %v3502_v63 = vpack.i.bf16 %v1889_v2, %v1888_v14  ;;  %v1903_v56 = vpack.c.bf16 %v1889_v2, %v1888_v14  ;;  %v1795_v14 = vmul.f32 2.0, %v4142_v35 }
 0x838   : > { %3561 = vrcp.f32 %v1608_v11  ;;  %3503 = vrot.lane.b32.xlu1 %v3502_v63, %s3703_s14  ;;  %v1800_v11 = vmul.f32 2.0, %v4243_v62 }
 0x842   : > { %v3562_v1 = vpop.eup %3561 }
 0x843   : > { %v1610_v57 = vmul.f32 %v3562_v1, %v3554_v19  ;;  %v1611_v53 = vmul.f32 %v3562_v1, %v3556_v59  ;;  %v1612_v23 = vmul.f32 %v3562_v1, %v3558_v10  ;;  %v1613_v24 = vmul.f32 %v3562_v1, %v3560_v32 }
 0x844   : > { %v4841_v19 = vpack.c.bf16 %v4477_v15, %v4473_v6  ;;  %v1796_v15 = vmul.f32 2.0, %v4161_v17  ;;  %v1798_v1 = vmul.f32 2.0, %v4203_v27 }
 0x845   : > { %v1715_v39 = vpack.c.bf16 %v1611_v53, %v1610_v57  ;;  %v1716_v36 = vpack.c.bf16 %v1613_v24, %v1612_v23  ;;  %v1801_v24 = vmul.f32 2.0, %v4246_v26  ;;  %v4842_v26 = vmax.bf16 %v4458_v42, %v4454_v61 }
 0x847   : > { %3259 = vmatprep.subr.bf16.mxu1 %v1715_v39 }
 0x848   : > { %3260 = vmatpush3.bf16.msra.mxu1 %v1715_v39 }
 0x849   : > { %3261 = vmatprep.subr.bf16.mxu1 %v1716_v36 }
 0x84c   : > { %3262 = vmatpush3.bf16.msra.mxu1 %v1716_v36 }
 0x84d   : > { %3291 = vmatprep.subr.bf16.mxu1 %v4376_v25 }
 0x84f   : > { %3264 = vmatmul.mubr.msk.bf16.vlgmr.msra.gmra.mrb[64].mxu1 %vm553_vm1, %v4839_v5  ;;  %v1799_v5 = vmul.f32 2.0, %v4206_v49 }
 0x850   : > { %3267 = vmatprep.mubr.msk.bf16.mxu1 %vm553_vm1, %v4840_v47  ;;  %3292 = vmatpush3.bf16.msra.mxu1 %v4376_v25  ;;  %v4534_v25 = vstv %s367_s9  ;;  %s3627_s9 = scalar_lea.vmem %s4733_s18, 4096 }
 0x851   : > { %3297 = vmatprep.subr.bf16.mxu1 %v1903_v56  ;;  %p3628_p6 = scmp.ne.s32.totalorder %s4733_s18, %s3627_s9  ;;  %p3635_p10 = scmp.lt.s32.totalorder %s3633_s20, %s3627_s9 }
 0x853   : > { %p3629_p12 = pnand %p3628_p6, %p4866_p11  ;;  %p3636_p0 = por %p3635_p10, %p3634_p8 }
 0x855   : > { %p3630_p13 = pneg %p3629_p12 }
 0x857   : > { %3268 = vmatmul.mubr.msk.bf16.gmra.mrb[68].mxu1 %vm553_vm1, %v4841_v19  ;;  %p3637_p2 = pnand %p3636_p0, %p3630_p13 }
 0x8a2   : > { %v1892_v59 = vpop.permute.xlu1 %1891 }
 0x8a3   : > { %v1894_v10 = vpack.c.bf16 %v1892_v59, %v1887_v40 }
 0x8a5   : > { %1905 = vxpose.xlu1.c.b16.start.end [1/1] (short) (narrow) %v1894_v10, 32 }
 0x8aa   : > { %v3504_v32 = vpop.permute.xlu1 %3503 }
 0x8ab   : > { %v3506_v28 = vunpack.i.h.bf16 %v3504_v32  ;;  %v3505_v37 = vunpack.i.l.bf16 %v3504_v32 }
 0x8ad   : > { %v1904_v3 = vpack.c.bf16 %v3506_v28, %v3505_v37 }
 0x90b   : > { %v1913_v60 = vpop.trf.xlu1 }
 0x90c   : > { %3293 = vmatprep.mubr.msk.bf16.mxu1 %vm1523_vm3, %v1913_v60 }
 0x90f   : > { %v1914_v43 = vpop.trf.xlu1 }
 0x910   : > { %3294 = vmatmul.mubr.msk.bf16.vlgmr.msra.gmra.mrb[72].mxu1 %vm1523_vm3, %v1914_v43 }
 0x911   : > { %3298 = vmatpush3.bf16.msra.mxu1 %v1903_v56  ;;  %3301 = vmatprep.mubr.msk.bf16.mxu1 %vm553_vm1, %v4393_v34 }
 0x912   : > { %3299 = vmatprep.subr.bf16.mxu1 %v1904_v3 }
 0x915   : > { %3300 = vmatpush3.bf16.msra.mxu1 %v1904_v3 }
 0x916   : > { %3321 = vmatprep.subr.bf16.mxu1 %v4323_v46 }
 0x918   : > { %3302 = vmatmul.mubr.msk.bf16.vlgmr.msra.gmra.mrb[76].mxu1 %vm553_vm1, %v4402_v8 }
 0x919   : > { %3322 = vmatpush3.bf16.msra.mxu1 %v4323_v46  ;;  %3305 = vmatprep.mubr.msk.bf16.mxu1 %vm553_vm1, %v4407_v21 }
 0x91a   : > { %3323 = vmatprep.subr.bf16.mxu1 %v4330_v16 }
 0x91d   : > { %3324 = vmatpush3.bf16.msra.mxu1 %v4330_v16 }
 0x91e   : > { %3325 = vmatprep.subr.bf16.mxu1 %v4337_v0 }
 0x920   : > { %3306 = vmatmul.mubr.msk.bf16.gmra.mrb[80].mxu1 %vm553_vm1, %v4419_v9 }
 0x921   : > { %3326 = vmatpush3.bf16.msra.mxu1 %v4337_v0  ;;  %3337 = vmatprep.mubr.bf16.mxu1 %v4494_v58 }
 0x922   : > { %v3265_v6 = vpop.f32.mrb[64].mxu1  ;;  %3327 = vmatprep.subr.bf16.mxu1 %v4343_v20 }
 0x923   : > { %v1805_v22 = vmul.f32 %v3265_v6, %v4534_v25  ;;  %v1763_v40 = vpop.f32.mrb[65].mxu1 }
 0x924   : > { %v1803_v38 = vmul.f32 %v4534_v25, %v1763_v40  ;;  %v3266_v33 = vpop.f32.mrb[66].mxu1 }
 0x925   : > { %v1813_v50 = vadd.f32 %v1805_v22, %v1796_v15  ;;  %v1806_v12 = vmul.f32 %v3266_v33, %v4534_v25  ;;  %v1766_v58 = vpop.f32.mrb[67].mxu1  ;;  %3328 = vmatpush3.bf16.msra.mxu1 %v4343_v20 }
 0x926   : > { %v1811_v2 = vadd.f32 %v1803_v38, %v1794_v45  ;;  %v1804_v17 = vmul.f32 %v4534_v25, %v1766_v58  ;;  %3329 = vmatprep.subr.bf16.mxu1 %v4351_v44 }
 0x927   : > { %1821 = vst [vmem:[%s4551_s17 + $0x40] sm:$0xff] %v1813_v50  ;;  %v1814_v51 = vadd.f32 %v1806_v12, %v1797_v41 }
 0x928   : > { %1819 = vst [vmem:[%s4551_s17] sm:$0xff] %v1811_v2  ;;  %v1812_v18 = vadd.f32 %v1804_v17, %v1795_v14 }
 0x929   : > { %1822 = vst [vmem:[%s4551_s17 + $0x60] sm:$0xff] %v1814_v51  ;;  %3330 = vmatpush3.bf16.msra.mxu1 %v4351_v44 }
 0x92a   : > { %1820 = vst [vmem:[%s4551_s17 + $0x20] sm:$0xff] %v1812_v18  ;;  %v3269_v35 = vpop.f32.mrb[68].mxu1  ;;  %3331 = vmatprep.subr.bf16.mxu1 %v4358_v30 }
 0x92b   : > { %v1809_v63 = vmul.f32 %v3269_v35, %v4534_v25  ;;  %v1779_v56 = vpop.f32.mrb[69].mxu1 }
 0x92c   : > { %v1807_v57 = vmul.f32 %v4534_v25, %v1779_v56  ;;  %v3270_v53 = vpop.f32.mrb[70].mxu1 }
 0x92d   : > { %v1817_v23 = vadd.f32 %v1809_v63, %v1800_v11  ;;  %v1810_v39 = vmul.f32 %v3270_v53, %v4534_v25  ;;  %v1782_v36 = vpop.f32.mrb[71].mxu1  ;;  %3332 = vmatpush3.bf16.msra.mxu1 %v4358_v30 }
 0x92e   : > { %v1815_v62 = vadd.f32 %v1807_v57, %v1798_v1  ;;  %v1808_v47 = vmul.f32 %v4534_v25, %v1782_v36  ;;  %3333 = vmatprep.subr.bf16.mxu1 %v4365_v55 }
 0x92f   : > { %1825 = vst [vmem:[%s4551_s17 + $0xc0] sm:$0xff] %v1817_v23  ;;  %v1818_v27 = vadd.f32 %v1810_v39, %v1801_v24 }
 0x930   : > { %1823 = vst [vmem:[%s4551_s17 + $0x80] sm:$0xff] %v1815_v62  ;;  %v1816_v19 = vadd.f32 %v1808_v47, %v1799_v5 }
 0x931   : > { %1826 = vst [vmem:[%s4551_s17 + $0xe0] sm:$0xff] %v1818_v27  ;;  %3334 = vmatpush3.bf16.msra.mxu1 %v4365_v55 }
 0x932   : > { %1824 = vst [vmem:[%s4551_s17 + $0xa0] sm:$0xff] %v1816_v19  ;;  %3335 = vmatprep.subr.bf16.mxu1 %v4372_v7 }
 0x935   : > { %3336 = vmatpush3.bf16.msra.mxu1 %v4372_v7 }
 0x938   : > { %3338 = vmatmul.mubr.bf16.vlgmr.msra.gmra.mrb[84].mxu1 %v4842_v26 }
 0x9e3   : > { %v3295_v49 = vpop.f32.mrb[72].mxu1 }
 0x9e4   : > { %v1961_v59 = vpop.f32.mrb[73].mxu1 }
 0x9e5   : > { %v3296_v10 = vpop.f32.mrb[74].mxu1 }
 0x9e6   : > { %v1977_v32 = vmax.f32 %v3295_v49, %v3296_v10  ;;  %v1964_v60 = vpop.f32.mrb[75].mxu1 }
 0x9e7   : > { %v1976_v28 = vmax.f32 %v1961_v59, %v1964_v60 }
 0x9e9   : > { %v1978_v37 = vmax.f32 %v1976_v28, %v1977_v32 }
 0x9eb   : > { %v1979_v43 = vrot.slane %v1978_v37, 4  ;;  %v4579_v3 = vpop.f32.mrb[76].mxu1 }
 0x9ec   : > { %v2045_v6 = vpop.f32.mrb[77].mxu1 }
 0x9ed   : > { %v1980_v15 = vmax.f32 %v1978_v37, %v1979_v43  ;;  %v3304_v22 = vpop.f32.mrb[78].mxu1 }
 0x9ee   : > { %v2077_v40 = vpack.c.bf16 %v3304_v22, %v4579_v3  ;;  %v2048_v45 = vpop.f32.mrb[79].mxu1 }
 0x9ef   : > { %v1981_v38 = vrot.slane %v1980_v15, 2  ;;  %v2076_v33 = vpack.c.bf16 %v2048_v45, %v2045_v6 }
 0x9f1   : > { %v1982_v42 = vmax.f32 %v1980_v15, %v1981_v38  ;;  %3313 = vmatprep.mubr.msk.bf16.mxu0 %vm553_vm1, %v2076_v33 }
 0x9f3   : > { %v1983_v61 = vrot.slane %v1982_v42, 1  ;;  %v3307_v50 = vpop.f32.mrb[80].mxu1 }
 0x9f4   : > { %v2061_v41 = vpop.f32.mrb[81].mxu1 }
 0x9f5   : > { %v1984_v12 = vmax.f32 %v1982_v42, %v1983_v61  ;;  %v3308_v58 = vpop.f32.mrb[82].mxu1 }
 0x9f6   : > { %v2079_v2 = vpack.c.bf16 %v3308_v58, %v3307_v50  ;;  %v2064_v14 = vpop.f32.mrb[83].mxu1 }
 0x9f7   : > { %v1985_v17 = vsub.f32 %v1961_v59, %v1984_v12  ;;  %v1986_v51 = vsub.f32 %v1964_v60, %v1984_v12  ;;  %v1987_v18 = vsub.f32 %v3295_v49, %v1984_v12  ;;  %v1988_v35 = vsub.f32 %v3296_v10, %v1984_v12 }
 0x9f8   : > { %v2078_v11 = vpack.c.bf16 %v2064_v14, %v2061_v41 }
 0x9f9   : > { %v1989_v63 = vmul.f32 1.442695, %v1985_v17  ;;  %v1991_v56 = vmul.f32 1.442695, %v1986_v51  ;;  %v1993_v1 = vmul.f32 1.442695, %v1987_v18 }
 0x9fa   : > { %v1995_v57 = vmul.f32 1.442695, %v1988_v35 }
 0x9fb   : > { %3563 = vpow2.f32 %v1989_v63 }
 0x9fc   : > { %3565 = vpow2.f32 %v1991_v56 }
 0x9fd   : > { %3567 = vpow2.f32 %v1993_v1 }
 0x9fe   : > { %3569 = vpow2.f32 %v1995_v57  ;;  %v2162_v57 = vmul.f32 2.0, %v4172_v48 }
 0xa05   : > { %v3564_v53 = vpop.eup %3563 }
 0xa06   : > { %v3566_v23 = vpop.eup %3565 }
 0xa07   : > { %v1997_v24 = vadd.f32 %v3566_v23, %v3564_v53  ;;  %v3568_v39 = vpop.eup %3567 }
 0xa08   : > { %v3570_v62 = vpop.eup %3569 }
 0xa09   : > { %v1998_v36 = vadd.f32 %v3568_v39, %v1997_v24 }
 0xa0b   : > { %v1999_v5 = vadd.f32 %v3570_v62, %v1998_v36  ;;  %v3339_v47 = vpop.f32.mrb[84].mxu1 }
 0xa0c   : > { %v2225_v27 = vpop.f32.mrb[85].mxu1 }
 0xa0d   : > { %v2000_v19 = vrot.slane %v1999_v5, 4  ;;  %2242 = vrot.lane.b32.xlu0 %v2225_v27, %s3702_s21  ;;  %v3340_v26 = vpop.f32.mrb[86].mxu1 }
 0xa0e   : > { %v2228_v49 = vpop.f32.mrb[87].mxu1  ;;  %v4845_v26 = vld [vmem:[#allocation14_spill] sm:$0xff] }
 0xa0f   : > { %v2001_v59 = vadd.f32 %v2000_v19, %v1999_v5  ;;  %v3507_v10 = vpack.i.bf16 %v3339_v47, %v2228_v49 }
 0xa11   : > { %v2002_v32 = vrot.slane %v2001_v59, 2  ;;  %3508 = vrot.lane.b32.xlu0 %v3507_v10, %s3702_s21 }
 0xa13   : > { %v2003_v60 = vadd.f32 %v2002_v32, %v2001_v59 }
 0xa15   : > { %v2004_v28 = vrot.slane %v2003_v60, 1 }
 0xa17   : > { %v2005_v37 = vadd.f32 %v2004_v28, %v2003_v60  ;;  %v4846_v60 = vld [vmem:[#allocation21_spill] sm:$0xff] }
 0xa18   : > { %v2166_v28 = vmul.f32 2.0, %v4846_v60 }
 0xa19   : > { %3571 = vrcp.f32 %v2005_v37 }
 0xa23   : > { %v3572_v43 = vpop.eup %3571 }
 0xa24   : > { %v2007_v3 = vmul.f32 %v3572_v43, %v3564_v53  ;;  %v2008_v6 = vmul.f32 %v3572_v43, %v3566_v23  ;;  %v2009_v15 = vmul.f32 %v3572_v43, %v3568_v39  ;;  %v2010_v22 = vmul.f32 %v3572_v43, %v3570_v62  ;;  %v4843_v39 = vld [vmem:[#allocation9_spill] sm:$0xff] }
 0xa25   : > { %v2160_v36 = vmul.f32 2.0, %v4843_v39 }
 0xa26   : > { %v2080_v45 = vpack.c.bf16 %v2008_v6, %v2007_v3  ;;  %v2081_v38 = vpack.c.bf16 %v2010_v22, %v2009_v15  ;;  %v4847_v6 = vld [vmem:[#allocation15_spill] sm:$0xff] }
 0xa27   : > { %v2164_v15 = vmul.f32 2.0, %v4847_v6 }
 0xa28   : > { %3309 = vmatprep.subr.bf16.mxu0 %v2080_v45 }
 0xa29   : > { %3310 = vmatpush3.bf16.msra.mxu0 %v2080_v45 }
 0xa2a   : > { %3311 = vmatprep.subr.bf16.mxu0 %v2081_v38 }
 0xa2d   : > { %3312 = vmatpush3.bf16.msra.mxu0 %v2081_v38 }
 0xa2e   : > { %3341 = vmatprep.subr.bf16.mxu0 %v4438_v29 }
 0xa30   : > { %3314 = vmatmul.mubr.msk.bf16.vlgmr.msra.gmra.mrb[68].mxu0 %vm553_vm1, %v2077_v40 }
 0xa31   : > { %3317 = vmatprep.mubr.msk.bf16.mxu0 %vm553_vm1, %v2078_v11  ;;  %3342 = vmatpush3.bf16.msra.mxu0 %v4438_v29  ;;  %v2159_v11 = vmul.f32 2.0, %v4145_v52 }
 0xa38   : > { %3318 = vmatmul.mubr.msk.bf16.gmra.mrb[72].mxu0 %vm553_vm1, %v2079_v2  ;;  %v2161_v2 = vmul.f32 2.0, %v4169_v31 }
 0xa7f   : > { %v2243_v33 = vpop.permute.xlu0 %2242 }
 0xa80   : > { %v2251_v42 = vmax.f32 %v2225_v27, %v2243_v33 }
 0xa82   : > { %2255 = vrot.lane.b32.xlu0 %v2251_v42, %s3703_s14 }
 0xa83   : > { %v3509_v61 = vpop.permute.xlu0 %3508 }
 0xa84   : > { %v3511_v50 = vunpack.i.h.bf16 %v3509_v61  ;;  %v3510_v41 = vunpack.i.l.bf16 %v3509_v61 }
 0xa86   : > { %v2253_v12 = vmax.f32 %v3339_v47, %v3511_v50  ;;  %v2252_v58 = vmax.f32 %v2228_v49, %v3510_v41  ;;  %v4844_v47 = vld [vmem:[#allocation20_spill] sm:$0xff]  ;;  %v2163_v49 = vmul.f32 2.0, %v4845_v26 }
 0xa87   : > { %v2165_v27 = vmul.f32 2.0, %v4844_v47 }
 0xa88   : > { %v3512_v14 = vpack.i.bf16 %v2253_v12, %v2252_v58  ;;  %v2267_v17 = vpack.c.bf16 %v2253_v12, %v2252_v58 }
 0xa8a   : > { %3513 = vrot.lane.b32.xlu0 %v3512_v14, %s3703_s14  ;;  %3347 = vmatprep.subr.bf16.mxu0 %v2267_v17 }
 0xaf4   : > { %v2256_v40 = vpop.permute.xlu0 %2255 }
 0xaf5   : > { %v2258_v51 = vpack.c.bf16 %v2256_v40, %v2251_v42 }
 0xaf7   : > { %2269 = vxpose.xlu1.c.b16.start.end [1/1] (short) (narrow) %v2258_v51, 32 }
 0xafc   : > { %v3514_v33 = vpop.permute.xlu0 %3513 }
 0xafd   : > { %v3516_v61 = vunpack.i.h.bf16 %v3514_v33  ;;  %v3515_v50 = vunpack.i.l.bf16 %v3514_v33 }
 0xaff   : > { %v2268_v12 = vpack.c.bf16 %v3516_v61, %v3515_v50  ;;  %v4849_v61 = vld [vmem:[#allocation30_spill] sm:$0xff] }
 0xb03   : > { %v3315_v29 = vpop.f32.mrb[68].mxu0 }
 0xb04   : > { %v2169_v18 = vmul.f32 %v3315_v29, %v4534_v25  ;;  %v2128_v35 = vpop.f32.mrb[69].mxu0 }
 0xb05   : > { %v2167_v63 = vmul.f32 %v2128_v35, %v4534_v25  ;;  %v3316_v56 = vpop.f32.mrb[70].mxu0 }
 0xb06   : > { %v2177_v1 = vadd.f32 %v2169_v18, %v2161_v2  ;;  %v2170_v53 = vmul.f32 %v3316_v56, %v4534_v25  ;;  %v2131_v23 = vpop.f32.mrb[71].mxu0 }
 0xb07   : > { %v2175_v24 = vadd.f32 %v2167_v63, %v2159_v11  ;;  %v2168_v31 = vmul.f32 %v2131_v23, %v4534_v25 }
 0xb08   : > { %2185 = vst [vmem:[%s4551_s17 + $0x48] sm:$0xff] %v2177_v1  ;;  %v2178_v62 = vadd.f32 %v2170_v53, %v2162_v57 }
 0xb09   : > { %2183 = vst [vmem:[%s4551_s17 + $0x8] sm:$0xff] %v2175_v24  ;;  %v2176_v5 = vadd.f32 %v2168_v31, %v2160_v36 }
 0xb0a   : > { %2186 = vst [vmem:[%s4551_s17 + $0x68] sm:$0xff] %v2178_v62 }
 0xb0b   : > { %2184 = vst [vmem:[%s4551_s17 + $0x28] sm:$0xff] %v2176_v5  ;;  %v3319_v52 = vpop.f32.mrb[72].mxu0 }
 0xb0c   : > { %v2173_v48 = vmul.f32 %v3319_v52, %v4534_v25  ;;  %v2144_v19 = vpop.f32.mrb[73].mxu0 }
 0xb0d   : > { %v2171_v59 = vmul.f32 %v2144_v19, %v4534_v25  ;;  %v3320_v10 = vpop.f32.mrb[74].mxu0 }
 0xb0e   : > { %v2181_v32 = vadd.f32 %v2173_v48, %v2165_v27  ;;  %v2174_v37 = vmul.f32 %v3320_v10, %v4534_v25  ;;  %v2147_v43 = vpop.f32.mrb[75].mxu0 }
 0xb0f   : > { %v2179_v3 = vadd.f32 %v2171_v59, %v2163_v49  ;;  %v2172_v22 = vmul.f32 %v2147_v43, %v4534_v25 }
 0xb10   : > { %2189 = vst [vmem:[%s4551_s17 + $0xc8] sm:$0xff] %v2181_v32  ;;  %v2182_v45 = vadd.f32 %v2174_v37, %v2166_v28 }
 0xb11   : > { %2187 = vst [vmem:[%s4551_s17 + $0x88] sm:$0xff] %v2179_v3  ;;  %v2180_v38 = vadd.f32 %v2172_v22, %v2164_v15 }
 0xb12   : > { %2190 = vst [vmem:[%s4551_s17 + $0xe8] sm:$0xff] %v2182_v45 }
 0xb13   : > { %2188 = vst [vmem:[%s4551_s17 + $0xa8] sm:$0xff] %v2180_v38 }
 0xb5d   : > { %v2277_v42 = vpop.trf.xlu1 }
 0xb5e   : > { %3343 = vmatprep.mubr.msk.bf16.mxu0 %vm1523_vm3, %v2277_v42 }
 0xb61   : > { %v2278_v41 = vpop.trf.xlu1 }
 0xb62   : > { %3344 = vmatmul.mubr.msk.bf16.vlgmr.msra.gmra.mrb[76].mxu0 %vm1523_vm3, %v2278_v41 }
 0xb63   : > { %3348 = vmatpush3.bf16.msra.mxu0 %v2267_v17  ;;  %3351 = vmatprep.mubr.msk.bf16.mxu0 %vm553_vm1, %v4393_v34 }
 0xb64   : > { %3349 = vmatprep.subr.bf16.mxu0 %v2268_v12 }
 0xb67   : > { %3350 = vmatpush3.bf16.msra.mxu0 %v2268_v12 }
 0xb68   : > { %3371 = vmatprep.subr.bf16.mxu0 %v4323_v46 }
 0xb6a   : > { %3352 = vmatmul.mubr.msk.bf16.vlgmr.msra.gmra.mrb[80].mxu0 %vm553_vm1, %v4402_v8 }
 0xb6b   : > { %3372 = vmatpush3.bf16.msra.mxu0 %v4323_v46  ;;  %3355 = vmatprep.mubr.msk.bf16.mxu0 %vm553_vm1, %v4407_v21  ;;  %v4848_v46 = vmax.bf16 %v4460_v13, %v4456_v4 }
 0xb6c   : > { %3373 = vmatprep.subr.bf16.mxu0 %v4330_v16 }
 0xb6f   : > { %3374 = vmatpush3.bf16.msra.mxu0 %v4330_v16 }
 0xb70   : > { %3375 = vmatprep.subr.bf16.mxu0 %v4337_v0 }
 0xb72   : > { %3356 = vmatmul.mubr.msk.bf16.gmra.mrb[84].mxu0 %vm553_vm1, %v4419_v9 }
 0xb73   : > { %3376 = vmatpush3.bf16.msra.mxu0 %v4337_v0  ;;  %3387 = vmatprep.mubr.bf16.mxu0 %v4501_v54 }
 0xb74   : > { %3377 = vmatprep.subr.bf16.mxu0 %v4343_v20 }
 0xb77   : > { %3378 = vmatpush3.bf16.msra.mxu0 %v4343_v20 }
 0xb78   : > { %3379 = vmatprep.subr.bf16.mxu0 %v4351_v44 }
 0xb7b   : > { %3380 = vmatpush3.bf16.msra.mxu0 %v4351_v44 }
 0xb7c   : > { %3381 = vmatprep.subr.bf16.mxu0 %v4358_v30 }
 0xb7f   : > { %3382 = vmatpush3.bf16.msra.mxu0 %v4358_v30 }
 0xb80   : > { %3383 = vmatprep.subr.bf16.mxu0 %v4365_v55 }
 0xb83   : > { %3384 = vmatpush3.bf16.msra.mxu0 %v4365_v55 }
 0xb84   : > { %3385 = vmatprep.subr.bf16.mxu0 %v4372_v7 }
 0xb87   : > { %3386 = vmatpush3.bf16.msra.mxu0 %v4372_v7 }
 0xb8a   : > { %3388 = vmatmul.mubr.bf16.vlgmr.msra.gmra.mrb[88].mxu0 %v4848_v46 }
 0xc35   : > { %v3345_v16 = vpop.f32.mrb[76].mxu0 }
 0xc36   : > { %v2325_v0 = vpop.f32.mrb[77].mxu0 }
 0xc37   : > { %v3346_v20 = vpop.f32.mrb[78].mxu0 }
 0xc38   : > { %v2341_v44 = vmax.f32 %v3345_v16, %v3346_v20  ;;  %v2328_v34 = vpop.f32.mrb[79].mxu0 }
 0xc39   : > { %v2340_v8 = vmax.f32 %v2325_v0, %v2328_v34 }
 0xc3b   : > { %v2342_v21 = vmax.f32 %v2340_v8, %v2341_v44 }
 0xc3d   : > { %v2343_v30 = vrot.slane %v2342_v21, 4  ;;  %v4646_v9 = vpop.f32.mrb[80].mxu0 }
 0xc3e   : > { %v2409_v54 = vpop.f32.mrb[81].mxu0 }
 0xc3f   : > { %v2344_v55 = vmax.f32 %v2342_v21, %v2343_v30  ;;  %v3354_v58 = vpop.f32.mrb[82].mxu0 }
 0xc40   : > { %v2441_v14 = vpack.c.bf16 %v3354_v58, %v4646_v9  ;;  %v2412_v7 = vpop.f32.mrb[83].mxu0  ;;  %v4850_v9 = vld [vmem:[#allocation16_spill] sm:$0xff] }
 0xc41   : > { %v2345_v17 = vrot.slane %v2344_v55, 2  ;;  %v2440_v40 = vpack.c.bf16 %v2412_v7, %v2409_v54  ;;  %v2525_v54 = vmul.f32 2.0, %v4850_v9 }
 0xc43   : > { %v2346_v13 = vmax.f32 %v2344_v55, %v2345_v17  ;;  %3363 = vmatprep.mubr.msk.bf16.mxu1 %vm553_vm1, %v2440_v40 }
 0xc45   : > { %v2347_v4 = vrot.slane %v2346_v13, 1  ;;  %v3357_v51 = vpop.f32.mrb[84].mxu0 }
 0xc46   : > { %v2425_v29 = vpop.f32.mrb[85].mxu0 }
 0xc47   : > { %v2348_v2 = vmax.f32 %v2346_v13, %v2347_v4  ;;  %v3358_v18 = vpop.f32.mrb[86].mxu0  ;;  %v4852_v4 = vld [vmem:[#allocation17_spill] sm:$0xff] }
 0xc48   : > { %v2443_v35 = vpack.c.bf16 %v3358_v18, %v3357_v51  ;;  %v2428_v11 = vpop.f32.mrb[87].mxu0  ;;  %v2526_v51 = vmul.f32 2.0, %v4852_v4 }
 0xc49   : > { %v2349_v63 = vsub.f32 %v2325_v0, %v2348_v2  ;;  %v2350_v56 = vsub.f32 %v2328_v34, %v2348_v2  ;;  %v2351_v1 = vsub.f32 %v3345_v16, %v2348_v2  ;;  %v2352_v57 = vsub.f32 %v3346_v20, %v2348_v2 }
 0xc4a   : > { %v2442_v53 = vpack.c.bf16 %v2428_v11, %v2425_v29 }
 0xc4b   : > { %v2353_v23 = vmul.f32 1.442695, %v2349_v63  ;;  %v2355_v24 = vmul.f32 1.442695, %v2350_v56  ;;  %v2357_v39 = vmul.f32 1.442695, %v2351_v1 }
 0xc4c   : > { %v2359_v36 = vmul.f32 1.442695, %v2352_v57 }
 0xc4d   : > { %3573 = vpow2.f32 %v2353_v23 }
 0xc4e   : > { %3575 = vpow2.f32 %v2355_v24 }
 0xc4f   : > { %3577 = vpow2.f32 %v2357_v39 }
 0xc50   : > { %3579 = vpow2.f32 %v2359_v36  ;;  %v4855_v36 = vld [vmem:[#allocation22_spill] sm:$0xff] }
 0xc57   : > { %v3574_v31 = vpop.eup %3573 }
 0xc58   : > { %v3576_v62 = vpop.eup %3575 }
 0xc59   : > { %v2361_v5 = vadd.f32 %v3576_v62, %v3574_v31  ;;  %v3578_v52 = vpop.eup %3577 }
 0xc5a   : > { %v3580_v27 = vpop.eup %3579 }
 0xc5b   : > { %v2362_v47 = vadd.f32 %v3578_v52, %v2361_v5 }
 0xc5d   : > { %v2363_v48 = vadd.f32 %v3580_v27, %v2362_v47  ;;  %v3389_v19 = vpop.f32.mrb[88].mxu0  ;;  %v4856_v47 = vld [vmem:[#allocation27_spill] sm:$0xff] }
 0xc5e   : > { %v2589_v26 = vpop.f32.mrb[89].mxu0 }
 0xc5f   : > { %v2364_v49 = vrot.slane %v2363_v48, 4  ;;  %2606 = vrot.lane.b32.xlu0 %v2589_v26, %s3702_s21  ;;  %v3390_v59 = vpop.f32.mrb[90].mxu0 }
 0xc60   : > { %v2592_v10 = vpop.f32.mrb[91].mxu0 }
 0xc61   : > { %v2365_v32 = vadd.f32 %v2364_v49, %v2363_v48  ;;  %v3517_v60 = vpack.i.bf16 %v3389_v19, %v2592_v10  ;;  %v4857_v49 = vld [vmem:[#allocation23_spill] sm:$0xff] }
 0xc62   : > { %v2528_v59 = vmul.f32 2.0, %v4857_v49 }
 0xc63   : > { %v2366_v28 = vrot.slane %v2365_v32, 2  ;;  %3518 = vrot.lane.b32.xlu0 %v3517_v60, %s3702_s21 }
 0xc65   : > { %v2367_v37 = vadd.f32 %v2366_v28, %v2365_v32 }
 0xc67   : > { %v2368_v43 = vrot.slane %v2367_v37, 1 }
 0xc69   : > { %v2369_v3 = vadd.f32 %v2368_v43, %v2367_v37 }
 0xc6b   : > { %3581 = vrcp.f32 %v2369_v3 }
 0xc75   : > { %v3582_v6 = vpop.eup %3581 }
 0xc76   : > { %v2371_v15 = vmul.f32 %v3582_v6, %v3574_v31  ;;  %v2372_v22 = vmul.f32 %v3582_v6, %v3576_v62  ;;  %v2373_v45 = vmul.f32 %v3582_v6, %v3578_v52  ;;  %v2374_v38 = vmul.f32 %v3582_v6, %v3580_v27 }
 0xc77   : > { %v2527_v31 = vmul.f32 2.0, %v4855_v36  ;;  %v2530_v27 = vmul.f32 2.0, %v4856_v47 }
 0xc78   : > { %v2444_v33 = vpack.c.bf16 %v2372_v22, %v2371_v15  ;;  %v2445_v42 = vpack.c.bf16 %v2374_v38, %v2373_v45  ;;  %v3593_v22 = vld [vmem:[%s4782_s2 + $0x40] sm:$0xff]   ;;  %v3594_v45 = vld [vmem:[%s4782_s2 + $0x48] sm:$0xff]   ;;  %v3595_v38 = vld [vmem:[%s4782_s2 + $0x50] sm:$0xff]  }
 0xc7a   : > { %3359 = vmatprep.subr.bf16.mxu1 %v2444_v33 }
 0xc7b   : > { %3360 = vmatpush3.bf16.msra.mxu1 %v2444_v33  ;;  %v3596_v33 = vld [vmem:[%s4782_s2 + $0x58] sm:$0xff]  }
 0xc7c   : > { %3361 = vmatprep.subr.bf16.mxu1 %v2445_v42 }
 0xc7f   : > { %3362 = vmatpush3.bf16.msra.mxu1 %v2445_v42 }
 0xc80   : > { %3391 = vmatprep.subr.bf16.mxu1 %v4849_v61 }
 0xc82   : > { %3364 = vmatmul.mubr.msk.bf16.vlgmr.msra.gmra.mrb[88].mxu1 %vm553_vm1, %v2441_v14  ;;  %v4851_v14 = vld [vmem:[#allocation10_spill] sm:$0xff] }
 0xc83   : > { %3367 = vmatprep.mubr.msk.bf16.mxu1 %vm553_vm1, %v2442_v53  ;;  %3392 = vmatpush3.bf16.msra.mxu1 %v4849_v61  ;;  %v2523_v7 = vmul.f32 2.0, %v4851_v14  ;;  %v4854_v53 = vld [vmem:[#allocation26_spill] sm:$0xff] }
 0xc84   : > { %v2529_v23 = vmul.f32 2.0, %v4854_v53 }
 0xc8a   : > { %3368 = vmatmul.mubr.msk.bf16.gmra.mrb[92].mxu1 %vm553_vm1, %v2443_v35  ;;  %v4853_v35 = vld [vmem:[#allocation11_spill] sm:$0xff] }
 0xc8b   : > { %v2524_v11 = vmul.f32 2.0, %v4853_v35 }
 0xcd1   : > { %v2607_v50 = vpop.permute.xlu0 %2606 }
 0xcd2   : > { %v2615_v41 = vmax.f32 %v2589_v26, %v2607_v50 }
 0xcd4   : > { %2619 = vrot.lane.b32.xlu1 %v2615_v41, %s3703_s14 }
 0xcd5   : > { %v3519_v12 = vpop.permute.xlu0 %3518 }
 0xcd6   : > { %v3521_v46 = vunpack.i.h.bf16 %v3519_v12  ;;  %v3520_v16 = vunpack.i.l.bf16 %v3519_v12 }
 0xcd8   : > { %v2617_v0 = vmax.f32 %v3389_v19, %v3521_v46  ;;  %v2616_v20 = vmax.f32 %v2592_v10, %v3520_v16 }
 0xcda   : > { %v3522_v44 = vpack.i.bf16 %v2617_v0, %v2616_v20  ;;  %v2631_v34 = vpack.c.bf16 %v2617_v0, %v2616_v20 }
 0xcdc   : > { %3523 = vrot.lane.b32.xlu1 %v3522_v44, %s3703_s14  ;;  %3397 = vmatprep.subr.bf16.mxu1 %v2631_v34 }
 0xd46   : > { %v2620_v8 = vpop.permute.xlu1 %2619 }
 0xd47   : > { %v2622_v21 = vpack.c.bf16 %v2620_v8, %v2615_v41 }
 0xd49   : > { %2633 = vxpose.xlu0.c.b16.start.end [1/1] (short) (narrow) %v2622_v21, 32 }
 0xd4e   : > { %v3524_v28 = vpop.permute.xlu1 %3523 }
 0xd4f   : > { %v3526_v43 = vunpack.i.h.bf16 %v3524_v28  ;;  %v3525_v3 = vunpack.i.l.bf16 %v3524_v28 }
 0xd51   : > { %v2632_v15 = vpack.c.bf16 %v3526_v43, %v3525_v3 }
 0xd55   : > { %v3365_v30 = vpop.f32.mrb[88].mxu1 }
 0xd56   : > { %v2533_v55 = vmul.f32 %v3365_v30, %v4534_v25  ;;  %v2492_v58 = vpop.f32.mrb[89].mxu1 }
 0xd57   : > { %v2531_v17 = vmul.f32 %v2492_v58, %v4534_v25  ;;  %v3366_v40 = vpop.f32.mrb[90].mxu1 }
 0xd58   : > { %v2541_v13 = vadd.f32 %v2533_v55, %v2525_v54  ;;  %v2534_v29 = vmul.f32 %v3366_v40, %v4534_v25  ;;  %v2495_v2 = vpop.f32.mrb[91].mxu1 }
 0xd59   : > { %v2539_v18 = vadd.f32 %v2531_v17, %v2523_v7  ;;  %v2532_v63 = vmul.f32 %v2495_v2, %v4534_v25 }
 0xd5a   : > { %2549 = vst [vmem:[%s4551_s17 + $0x50] sm:$0xff] %v2541_v13  ;;  %v2542_v56 = vadd.f32 %v2534_v29, %v2526_v51 }
 0xd5b   : > { %2547 = vst [vmem:[%s4551_s17 + $0x10] sm:$0xff] %v2539_v18  ;;  %v2540_v1 = vadd.f32 %v2532_v63, %v2524_v11 }
 0xd5c   : > { %2550 = vst [vmem:[%s4551_s17 + $0x70] sm:$0xff] %v2542_v56 }
 0xd5d   : > { %2548 = vst [vmem:[%s4551_s17 + $0x30] sm:$0xff] %v2540_v1  ;;  %v3369_v57 = vpop.f32.mrb[92].mxu1 }
 0xd5e   : > { %v2537_v24 = vmul.f32 %v3369_v57, %v4534_v25  ;;  %v2508_v39 = vpop.f32.mrb[93].mxu1 }
 0xd5f   : > { %v2535_v62 = vmul.f32 %v2508_v39, %v4534_v25  ;;  %v3370_v5 = vpop.f32.mrb[94].mxu1 }
 0xd60   : > { %v2545_v52 = vadd.f32 %v2537_v24, %v2529_v23  ;;  %v2538_v48 = vmul.f32 %v3370_v5, %v4534_v25  ;;  %v2511_v19 = vpop.f32.mrb[95].mxu1 }
 0xd61   : > { %v2543_v26 = vadd.f32 %v2535_v62, %v2527_v31  ;;  %v2536_v10 = vmul.f32 %v2511_v19, %v4534_v25 }
 0xd62   : > { %2553 = vst [vmem:[%s4551_s17 + $0xd0] sm:$0xff] %v2545_v52  ;;  %v2546_v32 = vadd.f32 %v2538_v48, %v2530_v27 }
 0xd63   : > { %2551 = vst [vmem:[%s4551_s17 + $0x90] sm:$0xff] %v2543_v26  ;;  %v2544_v60 = vadd.f32 %v2536_v10, %v2528_v59 }
 0xd64   : > { %2554 = vst [vmem:[%s4551_s17 + $0xf0] sm:$0xff] %v2546_v32 }
 0xd65   : > { %2552 = vst [vmem:[%s4551_s17 + $0xb0] sm:$0xff] %v2544_v60 }
 0xdaf   : > { %v2641_v37 = vpop.trf.xlu0 }
 0xdb0   : > { %3393 = vmatprep.mubr.msk.bf16.mxu1 %vm1523_vm3, %v2641_v37  ;;  %v4858_v37 = vld [vmem:[#allocation18_spill] sm:$0xff] }
 0xdb1   : > { %v2889_v43 = vmul.f32 2.0, %v4858_v37 }
 0xdb3   : > { %v2642_v6 = vpop.trf.xlu0 }
 0xdb4   : > { %3394 = vmatmul.mubr.msk.bf16.vlgmr.msra.gmra.mrb[96].mxu1 %vm1523_vm3, %v2642_v6 }
 0xdb5   : > { %3398 = vmatpush3.bf16.msra.mxu1 %v2631_v34  ;;  %3401 = vmatprep.mubr.msk.bf16.mxu1 %vm553_vm1, %v3593_v22 }
 0xdb6   : > { %3399 = vmatprep.subr.bf16.mxu1 %v2632_v15 }
 0xdb9   : > { %3400 = vmatpush3.bf16.msra.mxu1 %v2632_v15  ;;  %v4859_v15 = vld [vmem:[#allocation12_spill] sm:$0xff] }
 0xdba   : > { %v2887_v22 = vmul.f32 2.0, %v4859_v15 }
 0xdbc   : > { %3402 = vmatmul.mubr.msk.bf16.vlgmr.msra.gmra.mrb[100].mxu1 %vm553_vm1, %v3594_v45 }
 0xdbd   : > { %3405 = vmatprep.mubr.msk.bf16.mxu1 %vm553_vm1, %v3595_v38 }
 0xdc4   : > { %3406 = vmatmul.mubr.msk.bf16.gmra.mrb[104].mxu1 %vm553_vm1, %v3596_v33 }
 0xe87   : > { %v3395_v42 = vpop.f32.mrb[96].mxu1 }
 0xe88   : > { %v2689_v61 = vpop.f32.mrb[97].mxu1 }
 0xe89   : > { %v3396_v50 = vpop.f32.mrb[98].mxu1 }
 0xe8a   : > { %v2705_v41 = vmax.f32 %v3395_v42, %v3396_v50  ;;  %v2692_v12 = vpop.f32.mrb[99].mxu1 }
 0xe8b   : > { %v2704_v46 = vmax.f32 %v2689_v61, %v2692_v12 }
 0xe8d   : > { %v2706_v16 = vmax.f32 %v2704_v46, %v2705_v41  ;;  %v4861_v46 = vld [vmem:[#allocation13_spill] sm:$0xff] }
 0xe8f   : > { %v2707_v0 = vrot.slane %v2706_v16, 4  ;;  %v3403_v20 = vpop.f32.mrb[100].mxu1 }
 0xe90   : > { %v2773_v44 = vpop.f32.mrb[101].mxu1 }
 0xe91   : > { %v2708_v34 = vmax.f32 %v2706_v16, %v2707_v0  ;;  %v3404_v8 = vpop.f32.mrb[102].mxu1  ;;  %v2888_v16 = vmul.f32 2.0, %v4861_v46 }
 0xe92   : > { %v2805_v21 = vpack.c.bf16 %v3404_v8, %v3403_v20  ;;  %v2776_v30 = vpop.f32.mrb[103].mxu1  ;;  %v4862_v8 = vld [vmem:[#allocation28_spill] sm:$0xff] }
 0xe93   : > { %v2709_v9 = vrot.slane %v2708_v34, 2  ;;  %v2804_v54 = vpack.c.bf16 %v2776_v30, %v2773_v44 }
 0xe95   : > { %v2710_v55 = vmax.f32 %v2708_v34, %v2709_v9  ;;  %3413 = vmatprep.mubr.msk.bf16.mxu0 %vm553_vm1, %v2804_v54  ;;  %v4863_v54 = vld [vmem:[#allocation24_spill] sm:$0xff] }
 0xe97   : > { %v2711_v58 = vrot.slane %v2710_v55, 1  ;;  %v3407_v14 = vpop.f32.mrb[104].mxu1 }
 0xe98   : > { %v2789_v7 = vpop.f32.mrb[105].mxu1 }
 0xe99   : > { %v2712_v17 = vmax.f32 %v2710_v55, %v2711_v58  ;;  %v3408_v40 = vpop.f32.mrb[106].mxu1  ;;  %v2891_v55 = vmul.f32 2.0, %v4863_v54 }
 0xe9a   : > { %v2807_v13 = vpack.c.bf16 %v3408_v40, %v3407_v14  ;;  %v2792_v4 = vpop.f32.mrb[107].mxu1 }
 0xe9b   : > { %v2713_v51 = vsub.f32 %v2689_v61, %v2712_v17  ;;  %v2714_v29 = vsub.f32 %v2692_v12, %v2712_v17  ;;  %v2715_v2 = vsub.f32 %v3395_v42, %v2712_v17  ;;  %v2716_v18 = vsub.f32 %v3396_v50, %v2712_v17  ;;  %v4860_v42 = vld [vmem:[#allocation19_spill] sm:$0xff]  ;;  %v4864_v17 = vld [vmem:[#allocation29_spill] sm:$0xff] }
 0xe9c   : > { %v2806_v35 = vpack.c.bf16 %v2792_v4, %v2789_v7  ;;  %v2890_v61 = vmul.f32 2.0, %v4860_v42  ;;  %v2894_v40 = vmul.f32 2.0, %v4864_v17 }
 0xe9d   : > { %v2717_v11 = vmul.f32 1.442695, %v2713_v51  ;;  %v2719_v63 = vmul.f32 1.442695, %v2714_v29  ;;  %v2721_v56 = vmul.f32 1.442695, %v2715_v2 }
 0xe9e   : > { %v2723_v1 = vmul.f32 1.442695, %v2716_v18  ;;  %v4865_v29 = vld [vmem:[#allocation25_spill] sm:$0xff] }
 0xe9f   : > { %3583 = vpow2.f32 %v2717_v11  ;;  %v2892_v2 = vmul.f32 2.0, %v4865_v29 }
 0xea0   : > { %3585 = vpow2.f32 %v2719_v63 }
 0xea1   : > { %3587 = vpow2.f32 %v2721_v56 }
 0xea2   : > { %3589 = vpow2.f32 %v2723_v1 }
 0xea9   : > { %v3584_v57 = vpop.eup %3583 }
 0xeaa   : > { %v3586_v53 = vpop.eup %3585 }
 0xeab   : > { %v2725_v23 = vadd.f32 %v3586_v53, %v3584_v57  ;;  %v3588_v24 = vpop.eup %3587 }
 0xeac   : > { %v3590_v36 = vpop.eup %3589 }
 0xead   : > { %v2726_v39 = vadd.f32 %v3588_v24, %v2725_v23 }
 0xeaf   : > { %v2727_v31 = vadd.f32 %v3590_v36, %v2726_v39 }
 0xeb1   : > { %v2728_v62 = vrot.slane %v2727_v31, 4 }
 0xeb3   : > { %v2729_v5 = vadd.f32 %v2728_v62, %v2727_v31 }
 0xeb5   : > { %v2730_v52 = vrot.slane %v2729_v5, 2 }
 0xeb7   : > { %v2731_v47 = vadd.f32 %v2730_v52, %v2729_v5 }
 0xeb9   : > { %v2732_v27 = vrot.slane %v2731_v47, 1 }
 0xebb   : > { %v2733_v48 = vadd.f32 %v2732_v27, %v2731_v47 }
 0xebd   : > { %3591 = vrcp.f32 %v2733_v48 }
 0xec7   : > { %v3592_v19 = vpop.eup %3591 }
 0xec8   : > { %v2735_v26 = vmul.f32 %v3592_v19, %v3584_v57  ;;  %v2736_v49 = vmul.f32 %v3592_v19, %v3586_v53  ;;  %v2737_v59 = vmul.f32 %v3592_v19, %v3588_v24  ;;  %v2738_v10 = vmul.f32 %v3592_v19, %v3590_v36 }
 0xeca   : > { %v2808_v32 = vpack.c.bf16 %v2736_v49, %v2735_v26  ;;  %v2809_v60 = vpack.c.bf16 %v2738_v10, %v2737_v59 }
 0xecc   : > { %3409 = vmatprep.subr.bf16.mxu0 %v2808_v32 }
 0xecd   : > { %3410 = vmatpush3.bf16.msra.mxu0 %v2808_v32 }
 0xece   : > { %3411 = vmatprep.subr.bf16.mxu0 %v2809_v60 }
 0xed1   : > { %3412 = vmatpush3.bf16.msra.mxu0 %v2809_v60 }
 0xed4   : > { %3414 = vmatmul.mubr.msk.bf16.vlgmr.msra.gmra.mrb[92].mxu0 %vm553_vm1, %v2805_v21  ;;  %v2893_v21 = vmul.f32 2.0, %v4862_v8 }
 0xed5   : > { %3417 = vmatprep.mubr.msk.bf16.mxu0 %vm553_vm1, %v2806_v35 }
 0xedc   : > { %3418 = vmatmul.mubr.msk.bf16.gmra.mrb[96].mxu0 %vm553_vm1, %v2807_v13 }
 0xfa7   : > { %v3415_v28 = vpop.f32.mrb[92].mxu0 }
 0xfa8   : > { %v2897_v3 = vmul.f32 %v3415_v28, %v4534_v25  ;;  %v2856_v6 = vpop.f32.mrb[93].mxu0 }
 0xfa9   : > { %v2895_v45 = vmul.f32 %v2856_v6, %v4534_v25  ;;  %v3416_v38 = vpop.f32.mrb[94].mxu0 }
 0xfaa   : > { %v2905_v33 = vadd.f32 %v2897_v3, %v2889_v43  ;;  %v2898_v50 = vmul.f32 %v3416_v38, %v4534_v25  ;;  %v2859_v41 = vpop.f32.mrb[95].mxu0 }
 0xfab   : > { %v2903_v12 = vadd.f32 %v2895_v45, %v2887_v22  ;;  %v2896_v0 = vmul.f32 %v2859_v41, %v4534_v25 }
 0xfac   : > { %2913 = vst [vmem:[%s4551_s17 + $0x58] sm:$0xff] %v2905_v33  ;;  %v2906_v20 = vadd.f32 %v2898_v50, %v2890_v61 }
 0xfad   : > { %2911 = vst [vmem:[%s4551_s17 + $0x18] sm:$0xff] %v2903_v12  ;;  %v2904_v44 = vadd.f32 %v2896_v0, %v2888_v16 }
 0xfae   : > { %2914 = vst [vmem:[%s4551_s17 + $0x78] sm:$0xff] %v2906_v20 }
 0xfaf   : > { %2912 = vst [vmem:[%s4551_s17 + $0x38] sm:$0xff] %v2904_v44  ;;  %v3419_v34 = vpop.f32.mrb[96].mxu0 }
 0xfb0   : > { %v2901_v30 = vmul.f32 %v3419_v34, %v4534_v25  ;;  %v2872_v9 = vpop.f32.mrb[97].mxu0 }
 0xfb1   : > { %v2899_v58 = vmul.f32 %v2872_v9, %v4534_v25  ;;  %v3420_v14 = vpop.f32.mrb[98].mxu0 }
 0xfb2   : > { %v2909_v7 = vadd.f32 %v2901_v30, %v2893_v21  ;;  %v2902_v13 = vmul.f32 %v3420_v14, %v4534_v25  ;;  %v2875_v4 = vpop.f32.mrb[99].mxu0 }
 0xfb3   : > { %v2907_v51 = vadd.f32 %v2899_v58, %v2891_v55  ;;  %v2900_v18 = vmul.f32 %v2875_v4, %v4534_v25 }
 0xfb4   : > { %2917 = vst [vmem:[%s4551_s17 + $0xd8] sm:$0xff] %v2909_v7  ;;  %v2910_v35 = vadd.f32 %v2902_v13, %v2894_v40 }
 0xfb5   : > { %2915 = vst [vmem:[%s4551_s17 + $0x98] sm:$0xff] %v2907_v51  ;;  %v2908_v11 = vadd.f32 %v2900_v18, %v2892_v2 }
 0xfb6   : > { %2918 = vst [vmem:[%s4551_s17 + $0xf8] sm:$0xff] %v2910_v35 }
 0xfb7   : > { %2916 = vst [vmem:[%s4551_s17 + $0xb8] sm:$0xff] %v2908_v11 }
 0xfb8   : > { %3640 = shalt.err (!%p3637_p2)
}
 0xfb9   : > { %s3641_s17 = scalar_lea.hbm %s4731_s5, 4096  ;;  %s3645_s12 = scalar_lea.hbm %s4786_s6, 8192 }
 0xfba   : > { %p3642_p4 = scmp.ne.s32.totalorder %s4731_s5, %s3641_s17  ;;  %p3646_p9 = scmp.lt.u32.totalorder %s4731_s5, %s4786_s6 }
 0xfbb   : > { %p3647_p1 = scmp.lt.u32.totalorder %s3645_s12, %s3641_s17  ;;  %p3649_p6 = scmp.lt.u32.totalorder %s3641_s17, %s4731_s5 }
 0xfbc   : > { %p3643_p5 = pnand %p3642_p4, %p4866_p11 }
 0xfbd   : > { %p3648_p3 = por %p3647_p1, %p3646_p9 }
 0xfbe   : > { %p3644_p7 = pneg %p3643_p5 }
 0xfbf   : > { %p3650_p12 = por %p3649_p6, %p3648_p3 }
 0xfc1   : > { %p3651_p13 = pnand %p3650_p12, %p3644_p7 }
 0xfc3   : > { %3654 = shalt.err (!%p3651_p13)
}
 0xfc4   : > { %s3705_s16 = smov 512   ;;  %s3706_s22 = smov 32  }
 0xfc5   : > { %3427 = dma.vmem_to_hbm [thread:$0]  (%p4866_p11), %s4733_s18, 4096, %s4731_s5, %s2920_s8, %s3705_s16, %s3705_s16, %s3706_s22  }
 0xfc6 PF: > { %s2949_s30 = sand.u32 1, %s3681_s23   ;;  %p4867_p8 = scmp.ne.s32.totalorder %s4813_s11, 0 }
 0xfc7   : > { %p4868_p10 = scmp.ge.s32.totalorder %s3693_s26, 2  ;;  %s2950_s9 = scalar_lea.sflag [#allocation5], %s2949_s30 }
 0xfc9   : > { %p3434_p0 = pnand %p4868_p10, %p4867_p8 }
 0xfcb   : > { %3676 = dma.done.wait (!%p3434_p0), %s2950_s9, 4096  }
 0xfcc   : > { %3678 = vsyncadd (!%p3434_p0), %s2950_s9, 4294963200  ;;  %p20_p2 = scmp.ge.s32.totalorder %s3770_s28, 4   ;;  %s4869_s23 = smov %s3685_s24 }
 0xfcd   : > { %s4870_s24 = smov %s3689_s25  ;;  %s4871_s25 = smov %s3782_s7 }
 0xfce   : > { %s4872_s26 = smov %s3770_s28  ;;  %22 = sbr.rel (!%p20_p2) target bundleno = 7 (0x7), region = 89 }
 0xfd5   :  { %2955 = vsyncpa [#allocation4], 1 }
 0xfd6   :  { %2957 = vsyncpa [#allocation4 + $0x1], 1 }
 0xfd7   :  { %2958 = vsyncpa [#allocation5], 1 }
 0xfd8   :  { %2960 = vsyncpa [#allocation5 + $0x1], 1 }

</bundles_post_ra>
